<compile_context>
chip_gen: v7x
topology: tpu7x:2x2x1
jax: 0.10.0
libtpu: 0.0.40
codegen_flags: <defaults>
</compile_context>

<pallas_src>
import jax
import jax.numpy as jnp
from jax import lax
from jax.experimental import pallas as pl
from jax.experimental.pallas import tpu as pltpu

# The PyTorch source references a module-level global OPT_ATTN that is not defined in
# the snippet; default to the full formulation (include the decoder term out_d).
OPT_ATTN = False


def _round_up(x, m):
    return (x + m - 1) // m * m


def _pick_label_tile(L, Ha, budget_bytes=8 * 1024 * 1024):
    """Largest label tile whose bf16 U' block (x2 for double buffering) fits the budget."""
    per_label = Ha * Ha * 2 * 2                      # bf16, double buffered
    if L * per_label <= budget_bytes:
        return L
    cap = min(L, max(1, budget_bytes // per_label))
    for t in range((cap // 8) * 8, 7, -8):           # multiples of 8 that divide L
        if L % t == 0:
            return t
    return L  # TODO(synk): pad L to a multiple of 8 at scale instead of falling back.


def biaffine_kernel(e_rawT_ref, d_raw_ref,
                    w_e_ref, b_e_ref, w_d_ref, b_d_ref,
                    u_ref, out_ref, eT_sc, d_sc):
    """One (batch block, label tile) grid step.  out_ref: (bb, tl, Ld, Le)."""
    bb, tl, Ld, Le = out_ref.shape
    Ha = u_ref.shape[1]

    # Augmented MLPs, once per batch block (the label-tile axis is the inner grid axis,
    # so the cached activations are reused across all label tiles).  The augmented
    # weights make channel H of the outputs a constant 1 and padding channels 0, so
    # W_e / W_d / b are picked up "for free" by the U' contraction below.
    @pl.when(pl.program_id(1) == 0)
    def _():
        eT = jnp.dot(w_e_ref[...], e_rawT_ref[...],
                     preferred_element_type=jnp.float32) + b_e_ref[...]
        eT_sc[...] = jnp.maximum(eT, 0.0).astype(eT_sc.dtype)     # (Ha, bb*Le) bf16
        dA = jnp.dot(d_raw_ref[...], w_d_ref[...],
                     preferred_element_type=jnp.float32) + b_d_ref[...]
        d_sc[...] = jnp.maximum(dA, 0.0)                          # (bb*Ld, Ha) f32

    # Stage A: the dominant contraction over U' as ONE 2-D MXU matmul for the whole
    # label tile (bf16 operands, f32 accumulation).
    ue = jnp.dot(u_ref[...], eT_sc[...],
                 preferred_element_type=jnp.float32)              # (tl*Ha, bb*Le)
    # Splits the leading (sublane) dim only; Ha % 8 == 0 so this is a free re-view.
    ue3 = ue.reshape(tl, Ha, bb * Le)

    # Stage B: the small d-contraction, batched over the label tile.  The broadcast of
    # d is bounded by the tile (tl*Ld*Ha floats), not by L, and stage B is a tiny
    # fraction of stage A's MXU work.
    d_all = d_sc[...]
    for b in range(bb):                                           # static unroll, bb small
        d_b = d_all[b * Ld:(b + 1) * Ld, :]                       # (Ld, Ha)
        ue_b = ue3[:, :, b * Le:(b + 1) * Le]                     # (tl, Ha, Le)
        out_ref[b] = lax.dot_general(
            jnp.broadcast_to(d_b[None], (tl, Ld, Ha)), ue_b,
            dimension_numbers=(((2,), (1,)), ((0,), (0,))),
            preferred_element_type=jnp.float32)                   # (tl, Ld, Le)


def biaffine_attention(e_outputs, d_outputs, params, *, bb=None, tl=None):
    """e_outputs: (B, Le, Ee), d_outputs: (B, Ld, Ed).  Returns (B, Ld, Le, L)."""
    B, Le, Ee = e_outputs.shape
    Bd, Ld, Ed = d_outputs.shape
    assert B == Bd
    L, H = params["W_e"].shape
    Ha = _round_up(H + 1, 8)              # augmented hidden: ones channel + sublane pad

    if bb is None:
        # One batch block by default: U' is then streamed from HBM exactly once.
        # TODO(synk): for very large B pick bb | B with bb*Le % 128 == 0 to bound the
        # unrolled per-batch stage-B loop and the activation block sizes.
        bb = B
    if tl is None:
        tl = _pick_label_tile(L, Ha)
    assert B % bb == 0 and (bb == B or ((bb * Le) % 128 == 0 and (bb * Ld) % 8 == 0)), (bb, B)
    assert L % tl == 0 and (tl == L or tl % 8 == 0), (tl, L)

    f32, bf16 = jnp.float32, jnp.bfloat16

    # ---- wrapper-side layout plumbing (small next to U' traffic; in a real model the
    # ---- augmented/bf16 U' should be prepared once, not per forward call). ----------
    # e is fed pre-transposed so the e-MLP emits e^T directly (no in-kernel transpose).
    e_rawT = jnp.transpose(e_outputs.astype(f32), (2, 0, 1)).reshape(Ee, B * Le)
    d_rawF = d_outputs.astype(f32).reshape(B * Ld, Ed)

    # Augmented MLP weights: output channel H is a constant 1, channels > H are 0.
    w_eA = jnp.zeros((Ha, Ee), f32).at[:H].set(params["w_e_mlp"].astype(f32))
    b_eA = (jnp.zeros((Ha, 1), f32).at[:H, 0].set(params["b_e_mlp"].astype(f32))
            .at[H, 0].set(1.0))
    w_dA = jnp.zeros((Ed, Ha), f32).at[:, :H].set(params["w_d_mlp"].astype(f32).T)
    b_dA = (jnp.zeros((1, Ha), f32).at[0, :H].set(params["b_d_mlp"].astype(f32))
            .at[0, H].set(1.0))

    # Augmented U':  d~ @ U' @ e~^T == d U e^T + W_d.d (over q) + W_e.e (over p) + b.
    u_aug = jnp.zeros((L, Ha, Ha), f32)
    u_aug = u_aug.at[:, :H, :H].set(params["U"].astype(f32))
    u_aug = u_aug.at[:, H, :H].set(params["W_e"].astype(f32))
    if not OPT_ATTN:
        u_aug = u_aug.at[:, :H, H].set(params["W_d"].astype(f32))
    u_aug = u_aug.at[:, H, H].set(params["b"].reshape(L).astype(f32))
    # Row index of u_flat is (label, i); bf16 halves the dominant HBM traffic.
    # TODO(synk): on v7x, U' could additionally be fp8 with per-label scales.
    u_flat = u_aug.reshape(L * Ha, Ha).astype(bf16)

    args = (e_rawT, d_rawF, w_eA, b_eA, w_dA, b_dA, u_flat)
    grid = (B // bb, L // tl)

    def _invoke(single_buffer_weights):
        def rep(shape):
            # Weights whose block never changes across the grid: single-buffer them
            # (they are never re-fetched) to halve their VMEM residency.
            nd = len(shape)
            if single_buffer_weights:
                return pl.BlockSpec(shape, lambda ib, il, _n=nd: (0,) * _n,
                                    pipeline_mode=pl.Buffered(1))
            return pl.BlockSpec(shape, lambda ib, il, _n=nd: (0,) * _n)

        in_specs = [
            pl.BlockSpec((Ee, bb * Le), lambda ib, il: (0, ib)),      # e_rawT
            pl.BlockSpec((bb * Ld, Ed), lambda ib, il: (ib, 0)),      # d_rawF
            rep((Ha, Ee)), rep((Ha, 1)),                              # e-MLP (augmented)
            rep((Ed, Ha)), rep((1, Ha)),                              # d-MLP (augmented)
            pl.BlockSpec((tl * Ha, Ha), lambda ib, il: (il, 0)),      # U' tile (pipelined)
        ]
        out_specs = pl.BlockSpec((bb, tl, Ld, Le), lambda ib, il: (ib, il, 0, 0))

        return pl.pallas_call(
            biaffine_kernel,
            out_shape=jax.ShapeDtypeStruct((B, L, Ld, Le), jnp.float32),
            grid_spec=pltpu.PrefetchScalarGridSpec(
                num_scalar_prefetch=0,
                grid=grid,
                in_specs=in_specs,
                out_specs=out_specs,
                scratch_shapes=[
                    pltpu.VMEM((Ha, bb * Le), bf16),     # cached augmented e^T
                    pltpu.VMEM((bb * Ld, Ha), f32),      # cached augmented d
                ]),
            compiler_params=pltpu.CompilerParams(
                # Batch blocks are independent ("parallel" -> megacore sharding).  The
                # label-tile axis carries the cached MLP scratch (computed at il == 0),
                # so it must stay "arbitrary"; if per-chip batch is 1 on v7x, recompute
                # the MLPs per tile and mark it "parallel" instead.
                dimension_semantics=("parallel", "arbitrary"),
                # Explicit limit with headroom below v7x's 64 MiB physical VMEM; the
                # tile chooser keeps the double-buffered U' tile <= 16 MiB.
                vmem_limit_bytes=48 * 1024 * 1024),
        )(*args)

    try:
        out = _invoke(True)
    except Exception:
        # pl.Buffered(1) on the replicated weights is a VMEM-only optimization; fall
        # back to default double buffering if this JAX build rejects it.
        out = _invoke(False)

    # Module's final .permute(0, 2, 3, 1): (B, L, Ld, Le) -> (B, Ld, Le, L).
    # NOTE: this is a real HBM read+write of the output (not free).  It is small next
    # to the U' traffic here because Ld/Le are short; consumers that can accept the
    # kernel-native (B, L, Ld, Le) layout should skip it.
    return jnp.transpose(out, (0, 2, 3, 1))


def init_params(key, encoder_size, decoder_size, num_labels, hidden_size):
    """Deterministic synthetic parameters (shapes match the nn.Module)."""
    ks = jax.random.split(key, 7)

    def lin(k, shape):
        bound = 1.0 / float(shape[-1]) ** 0.5
        return jax.random.uniform(k, shape, jnp.float32, -bound, bound)

    def xavier_normal(k, shape):
        fan_in, fan_out = shape[-1], shape[-2]
        std = (2.0 / (fan_in + fan_out)) ** 0.5
        return std * jax.random.normal(k, shape, jnp.float32)

    return {
        "w_e_mlp": lin(ks[0], (hidden_size, encoder_size)),
        "b_e_mlp": lin(ks[1], (hidden_size,)),
        "w_d_mlp": lin(ks[2], (hidden_size, decoder_size)),
        "b_d_mlp": lin(ks[3], (hidden_size,)),
        "W_e": xavier_normal(ks[4], (num_labels, hidden_size)),
        "W_d": xavier_normal(ks[5], (num_labels, hidden_size)),
        "U": xavier_normal(ks[6], (num_labels, hidden_size, hidden_size)),
        "b": jnp.zeros((num_labels, 1, 1), jnp.float32),
    }


def reference(e_outputs, d_outputs, params):
    """Pure-JAX f32 reference mirroring the PyTorch forward."""
    e = jax.nn.relu(e_outputs @ params["w_e_mlp"].T + params["b_e_mlp"])  # (B, Le, H)
    d = jax.nn.relu(d_outputs @ params["w_d_mlp"].T + params["b_d_mlp"])  # (B, Ld, H)
    out_e = jnp.einsum('lh,bqh->blq', params["W_e"], e)[:, :, None, :]    # (B, L, 1, Le)
    out_u = jnp.einsum('bpi,lij,bqj->blpq', d, params["U"], e)            # (B, L, Ld, Le)
    out = out_e + out_u + params["b"][None]
    if not OPT_ATTN:
        out_d = jnp.einsum('lh,bph->blp', params["W_d"], d)[:, :, :, None]
        out = out + out_d
    return jnp.transpose(out, (0, 2, 3, 1))                               # (B, Ld, Le, L)


if __name__ == "__main__":
    key = jax.random.PRNGKey(0)

    batch = 2
    split_num = 6
    length_decoder = split_num          # Ld
    length_encoder = split_num + 2      # Le
    encoder_size = 48
    decoder_size = 40
    num_labels = 4
    hidden_size = 32

    k_e, k_d, k_p = jax.random.split(key, 3)
    e_outputs = jax.random.normal(k_e, (batch, length_encoder, encoder_size), jnp.float32)
    d_outputs = jax.random.normal(k_d, (batch, length_decoder, decoder_size), jnp.float32)
    params = init_params(k_p, encoder_size, decoder_size, num_labels, hidden_size)

    out = jax.block_until_ready(biaffine_attention(e_outputs, d_outputs, params))
    ref = jax.block_until_ready(reference(e_outputs, d_outputs, params))

    assert out.shape == (batch, length_decoder, length_encoder, num_labels), out.shape
    # bf16 U'/e^T operands (f32 accumulation) -> slightly looser tolerance than pure f32.
    assert jnp.allclose(out, ref, rtol=2e-2, atol=2e-2), \
        float(jnp.max(jnp.abs(out - ref)))
    print("KERNEL_OK")
</pallas_src>

<mosaic_0001>
module attributes {stable_mosaic.version = 11 : i64} {
  func.func @biaffine_kernel(%arg0: i32, %arg1: i32, %arg2: memref<48x16xf32, #tpu.memory_space<vmem>>, %arg3: memref<12x40xf32, #tpu.memory_space<vmem>>, %arg4: memref<40x48xf32, #tpu.memory_space<vmem>>, %arg5: memref<40x1xf32, #tpu.memory_space<vmem>>, %arg6: memref<40x40xf32, #tpu.memory_space<vmem>>, %arg7: memref<1x40xf32, #tpu.memory_space<vmem>>, %arg8: memref<160x40xbf16, #tpu.memory_space<vmem>>, %arg9: memref<2x4x6x8xf32, #tpu.memory_space<vmem>>, %arg10: memref<40x16xbf16, #tpu.memory_space<vmem>>, %arg11: memref<12x40xf32, #tpu.memory_space<vmem>>) attributes {dimension_semantics = [#tpu.dimension_semantics<parallel>, #tpu.dimension_semantics<arbitrary>], iteration_bounds = array<i64: 1, 1>, scalar_prefetch = 0 : i64, scratch_operands = 2 : i64, tpu.core_type = #tpu.core_type<tc>, window_params = [{transform_indices = @transform_0, window_bounds = array<i64: 48, 16>}, {transform_indices = @transform_1, window_bounds = array<i64: 12, 40>}, {pipeline_mode = #tpu.pipeline_mode<synchronous>, transform_indices = @transform_2, window_bounds = array<i64: 40, 48>}, {pipeline_mode = #tpu.pipeline_mode<synchronous>, transform_indices = @transform_3, window_bounds = array<i64: 40, 1>}, {pipeline_mode = #tpu.pipeline_mode<synchronous>, transform_indices = @transform_4, window_bounds = array<i64: 40, 40>}, {pipeline_mode = #tpu.pipeline_mode<synchronous>, transform_indices = @transform_5, window_bounds = array<i64: 1, 40>}, {transform_indices = @transform_6, window_bounds = array<i64: 160, 40>}, {transform_indices = @transform_7, window_bounds = array<i64: 2, 4, 6, 8>}]} {
    %c0_i32 = arith.constant 0 : i32
    %0 = arith.cmpi eq, %arg1, %c0_i32 : i32
    %1 = arith.extui %0 : i1 to i32
    %c0_i32_0 = arith.constant 0 : i32
    %2 = arith.cmpi ne, %1, %c0_i32_0 : i32
    scf.if %2 {
      %c0_15 = arith.constant 0 : index
      %c0_16 = arith.constant 0 : index
      %26 = vector.load %arg4[%c0_15, %c0_16] : memref<40x48xf32, #tpu.memory_space<vmem>>, vector<40x48xf32>
      %c0_17 = arith.constant 0 : index
      %c0_18 = arith.constant 0 : index
      %27 = vector.load %arg2[%c0_17, %c0_18] : memref<48x16xf32, #tpu.memory_space<vmem>>, vector<48x16xf32>
      %cst_19 = arith.constant dense<0.000000e+00> : vector<40x16xf32>
      %28 = tpu.matmul %26, %27, %cst_19 {dimension_numbers = #tpu.dot_dimension_numbers<[1], [0], [0], [1], [0, 0, 1, 1], [], []>} : vector<40x48xf32>, vector<48x16xf32>, vector<40x16xf32> -> vector<40x16xf32>
      %c0_20 = arith.constant 0 : index
      %c0_21 = arith.constant 0 : index
      %29 = vector.load %arg5[%c0_20, %c0_21] : memref<40x1xf32, #tpu.memory_space<vmem>>, vector<40x1xf32>
      %30 = vector.broadcast %29 : vector<40x1xf32> to vector<40x16xf32>
      %31 = arith.addf %28, %30 : vector<40x16xf32>
      %cst_22 = arith.constant 0.000000e+00 : f32
      %32 = vector.broadcast %cst_22 : f32 to vector<40x16xf32>
      %33 = arith.maximumf %31, %32 : vector<40x16xf32>
      %34 = arith.truncf %33 : vector<40x16xf32> to vector<40x16xbf16>
      %c0_23 = arith.constant 0 : index
      %c0_24 = arith.constant 0 : index
      %35 = vector.load %arg10[%c0_23, %c0_24] : memref<40x16xbf16, #tpu.memory_space<vmem>>, vector<40x16xbf16>
      tpu.vector_store %arg10[%c0_23, %c0_24], %34 {strides = array<i32>} : memref<40x16xbf16, #tpu.memory_space<vmem>>, vector<40x16xbf16>,
      %c0_25 = arith.constant 0 : index
      %c0_26 = arith.constant 0 : index
      %36 = vector.load %arg3[%c0_25, %c0_26] : memref<12x40xf32, #tpu.memory_space<vmem>>, vector<12x40xf32>
      %c0_27 = arith.constant 0 : index
      %c0_28 = arith.constant 0 : index
      %37 = vector.load %arg6[%c0_27, %c0_28] : memref<40x40xf32, #tpu.memory_space<vmem>>, vector<40x40xf32>
      %cst_29 = arith.constant dense<0.000000e+00> : vector<12x40xf32>
      %38 = tpu.matmul %36, %37, %cst_29 {dimension_numbers = #tpu.dot_dimension_numbers<[1], [0], [0], [1], [0, 0, 1, 1], [], []>} : vector<12x40xf32>, vector<40x40xf32>, vector<12x40xf32> -> vector<12x40xf32>
      %c0_30 = arith.constant 0 : index
      %c0_31 = arith.constant 0 : index
      %39 = vector.load %arg7[%c0_30, %c0_31] : memref<1x40xf32, #tpu.memory_space<vmem>>, vector<1x40xf32>
      %40 = vector.broadcast %39 : vector<1x40xf32> to vector<12x40xf32>
      %41 = arith.addf %38, %40 : vector<12x40xf32>
      %cst_32 = arith.constant 0.000000e+00 : f32
      %42 = vector.broadcast %cst_32 : f32 to vector<12x40xf32>
      %43 = arith.maximumf %41, %42 : vector<12x40xf32>
      %c0_33 = arith.constant 0 : index
      %c0_34 = arith.constant 0 : index
      %44 = vector.load %arg11[%c0_33, %c0_34] : memref<12x40xf32, #tpu.memory_space<vmem>>, vector<12x40xf32>
      tpu.vector_store %arg11[%c0_33, %c0_34], %43 {strides = array<i32>} : memref<12x40xf32, #tpu.memory_space<vmem>>, vector<12x40xf32>,
    } else {
    }
    %c0 = arith.constant 0 : index
    %c0_1 = arith.constant 0 : index
    %3 = vector.load %arg8[%c0, %c0_1] : memref<160x40xbf16, #tpu.memory_space<vmem>>, vector<160x40xbf16>
    %c0_2 = arith.constant 0 : index
    %c0_3 = arith.constant 0 : index
    %4 = vector.load %arg10[%c0_2, %c0_3] : memref<40x16xbf16, #tpu.memory_space<vmem>>, vector<40x16xbf16>
    %cst = arith.constant dense<0.000000e+00> : vector<160x16xf32>
    %5 = tpu.matmul %3, %4, %cst {dimension_numbers = #tpu.dot_dimension_numbers<[1], [0], [0], [1], [0, 0, 1, 1], [], []>} : vector<160x40xbf16>, vector<40x16xbf16>, vector<160x16xf32> -> vector<160x16xf32>
    %6 = vector.shape_cast %5 : vector<160x16xf32> to vector<4x40x16xf32>
    %c0_4 = arith.constant 0 : index
    %c0_5 = arith.constant 0 : index
    %7 = vector.load %arg11[%c0_4, %c0_5] : memref<12x40xf32, #tpu.memory_space<vmem>>, vector<12x40xf32>
    %8 = vector.extract_strided_slice %7 {offsets = [0, 0], sizes = [6, 40], strides = [1, 1]} : vector<12x40xf32> to vector<6x40xf32>
    %9 = vector.extract_strided_slice %6 {offsets = [0, 0, 0], sizes = [4, 40, 8], strides = [1, 1, 1]} : vector<4x40x16xf32> to vector<4x40x8xf32>
    %10 = vector.shape_cast %8 : vector<6x40xf32> to vector<1x6x40xf32>
    %11 = vector.shape_cast %10 : vector<1x6x40xf32> to vector<1x6x40xf32>
    %12 = vector.broadcast %11 : vector<1x6x40xf32> to vector<4x6x40xf32>
    %cst_6 = arith.constant dense<0.000000e+00> : vector<4x6x8xf32>
    %13 = tpu.matmul %12, %9, %cst_6 {dimension_numbers = #tpu.dot_dimension_numbers<[2], [1], [1], [2], [0, 0, 0, 1, 1, 2], [0], [0]>} : vector<4x6x40xf32>, vector<4x40x8xf32>, vector<4x6x8xf32> -> vector<4x6x8xf32>
    %c0_7 = arith.constant 0 : index
    %c0_8 = arith.constant 0 : index
    %c0_9 = arith.constant 0 : index
    %c0_10 = arith.constant 0 : index
    %14 = vector.load %arg9[%c0_7, %c0_8, %c0_9, %c0_10] : memref<2x4x6x8xf32, #tpu.memory_space<vmem>>, vector<1x4x6x8xf32>
    %15 = vector.shape_cast %14 : vector<1x4x6x8xf32> to vector<4x6x8xf32>
    %16 = vector.shape_cast %13 : vector<4x6x8xf32> to vector<1x4x6x8xf32>
    tpu.vector_store %arg9[%c0_7, %c0_8, %c0_9, %c0_10], %16 {strides = array<i32>} : memref<2x4x6x8xf32, #tpu.memory_space<vmem>>, vector<1x4x6x8xf32>,
    %17 = vector.extract_strided_slice %7 {offsets = [6, 0], sizes = [6, 40], strides = [1, 1]} : vector<12x40xf32> to vector<6x40xf32>
    %18 = vector.extract_strided_slice %6 {offsets = [0, 0, 8], sizes = [4, 40, 8], strides = [1, 1, 1]} : vector<4x40x16xf32> to vector<4x40x8xf32>
    %19 = vector.shape_cast %17 : vector<6x40xf32> to vector<1x6x40xf32>
    %20 = vector.shape_cast %19 : vector<1x6x40xf32> to vector<1x6x40xf32>
    %21 = vector.broadcast %20 : vector<1x6x40xf32> to vector<4x6x40xf32>
    %cst_11 = arith.constant dense<0.000000e+00> : vector<4x6x8xf32>
    %22 = tpu.matmul %21, %18, %cst_11 {dimension_numbers = #tpu.dot_dimension_numbers<[2], [1], [1], [2], [0, 0, 0, 1, 1, 2], [0], [0]>} : vector<4x6x40xf32>, vector<4x40x8xf32>, vector<4x6x8xf32> -> vector<4x6x8xf32>
    %c1 = arith.constant 1 : index
    %c0_12 = arith.constant 0 : index
    %c0_13 = arith.constant 0 : index
    %c0_14 = arith.constant 0 : index
    %23 = vector.load %arg9[%c1, %c0_12, %c0_13, %c0_14] : memref<2x4x6x8xf32, #tpu.memory_space<vmem>>, vector<1x4x6x8xf32>
    %24 = vector.shape_cast %23 : vector<1x4x6x8xf32> to vector<4x6x8xf32>
    %25 = vector.shape_cast %22 : vector<4x6x8xf32> to vector<1x4x6x8xf32>
    tpu.vector_store %arg9[%c1, %c0_12, %c0_13, %c0_14], %25 {strides = array<i32>} : memref<2x4x6x8xf32, #tpu.memory_space<vmem>>, vector<1x4x6x8xf32>,
    return
  }
  func.func @transform_0(%arg0: i32, %arg1: i32) -> (i32, i32) {
    %c0_i32 = arith.constant 0 : i32
    %c0_i32_0 = arith.constant 0 : i32
    return %c0_i32, %arg0 : i32, i32
  }
  func.func @transform_1(%arg0: i32, %arg1: i32) -> (i32, i32) {
    %c0_i32 = arith.constant 0 : i32
    %c0_i32_0 = arith.constant 0 : i32
    return %arg0, %c0_i32 : i32, i32
  }
  func.func @transform_2(%arg0: i32, %arg1: i32) -> (i32, i32) {
    %c0_i32 = arith.constant 0 : i32
    %c0_i32_0 = arith.constant 0 : i32
    %c0_i32_1 = arith.constant 0 : i32
    return %c0_i32, %c0_i32_0 : i32, i32
  }
  func.func @transform_3(%arg0: i32, %arg1: i32) -> (i32, i32) {
    %c0_i32 = arith.constant 0 : i32
    %c0_i32_0 = arith.constant 0 : i32
    %c0_i32_1 = arith.constant 0 : i32
    return %c0_i32, %c0_i32_0 : i32, i32
  }
  func.func @transform_4(%arg0: i32, %arg1: i32) -> (i32, i32) {
    %c0_i32 = arith.constant 0 : i32
    %c0_i32_0 = arith.constant 0 : i32
    %c0_i32_1 = arith.constant 0 : i32
    return %c0_i32, %c0_i32_0 : i32, i32
  }
  func.func @transform_5(%arg0: i32, %arg1: i32) -> (i32, i32) {
    %c0_i32 = arith.constant 0 : i32
    %c0_i32_0 = arith.constant 0 : i32
    %c0_i32_1 = arith.constant 0 : i32
    return %c0_i32, %c0_i32_0 : i32, i32
  }
  func.func @transform_6(%arg0: i32, %arg1: i32) -> (i32, i32) {
    %c0_i32 = arith.constant 0 : i32
    %c0_i32_0 = arith.constant 0 : i32
    return %arg1, %c0_i32 : i32, i32
  }
  func.func @transform_7(%arg0: i32, %arg1: i32) -> (i32, i32, i32, i32) {
    %c0_i32 = arith.constant 0 : i32
    %c0_i32_0 = arith.constant 0 : i32
    %c0_i32_1 = arith.constant 0 : i32
    return %arg0, %arg1, %c0_i32, %c0_i32_0 : i32, i32, i32, i32
  }
}

module attributes {stable_mosaic.version = 11 : i64} {
  func.func @biaffine_kernel(%arg0: i32, %arg1: i32, %arg2: memref<48x16xf32, #tpu.memory_space<vmem>>, %arg3: memref<12x40xf32, #tpu.memory_space<vmem>>, %arg4: memref<40x48xf32, #tpu.memory_space<vmem>>, %arg5: memref<40x1xf32, #tpu.memory_space<vmem>>, %arg6: memref<40x40xf32, #tpu.memory_space<vmem>>, %arg7: memref<1x40xf32, #tpu.memory_space<vmem>>, %arg8: memref<160x40xbf16, #tpu.memory_space<vmem>>, %arg9: memref<2x4x6x8xf32, #tpu.memory_space<vmem>>, %arg10: memref<40x16xbf16, #tpu.memory_space<vmem>>, %arg11: memref<12x40xf32, #tpu.memory_space<vmem>>) attributes {dimension_semantics = [#tpu.dimension_semantics<parallel>, #tpu.dimension_semantics<arbitrary>], iteration_bounds = array<i64: 1, 1>, scalar_prefetch = 0 : i64, scratch_operands = 2 : i64, tpu.core_type = #tpu.core_type<tc>, window_params = [{transform_indices = @transform_0, window_bounds = array<i64: 48, 16>}, {transform_indices = @transform_1, window_bounds = array<i64: 12, 40>}, {pipeline_mode = #tpu.pipeline_mode<synchronous>, transform_indices = @transform_2, window_bounds = array<i64: 40, 48>}, {pipeline_mode = #tpu.pipeline_mode<synchronous>, transform_indices = @transform_3, window_bounds = array<i64: 40, 1>}, {pipeline_mode = #tpu.pipeline_mode<synchronous>, transform_indices = @transform_4, window_bounds = array<i64: 40, 40>}, {pipeline_mode = #tpu.pipeline_mode<synchronous>, transform_indices = @transform_5, window_bounds = array<i64: 1, 40>}, {transform_indices = @transform_6, window_bounds = array<i64: 160, 40>}, {transform_indices = @transform_7, window_bounds = array<i64: 2, 4, 6, 8>}]} {
    %c0_i32 = arith.constant 0 : i32
    %0 = arith.cmpi eq, %arg1, %c0_i32 : i32
    %1 = arith.extui %0 : i1 to i32
    %c0_i32_0 = arith.constant 0 : i32
    %2 = arith.cmpi ne, %1, %c0_i32_0 : i32
    scf.if %2 {
      %c0_15 = arith.constant 0 : index
      %c0_16 = arith.constant 0 : index
      %26 = vector.load %arg4[%c0_15, %c0_16] : memref<40x48xf32, #tpu.memory_space<vmem>>, vector<40x48xf32>
      %c0_17 = arith.constant 0 : index
      %c0_18 = arith.constant 0 : index
      %27 = vector.load %arg2[%c0_17, %c0_18] : memref<48x16xf32, #tpu.memory_space<vmem>>, vector<48x16xf32>
      %cst_19 = arith.constant dense<0.000000e+00> : vector<40x16xf32>
      %28 = tpu.matmul %26, %27, %cst_19 {dimension_numbers = #tpu.dot_dimension_numbers<[1], [0], [0], [1], [0, 0, 1, 1], [], []>} : vector<40x48xf32>, vector<48x16xf32>, vector<40x16xf32> -> vector<40x16xf32>
      %c0_20 = arith.constant 0 : index
      %c0_21 = arith.constant 0 : index
      %29 = vector.load %arg5[%c0_20, %c0_21] : memref<40x1xf32, #tpu.memory_space<vmem>>, vector<40x1xf32>
      %30 = vector.broadcast %29 : vector<40x1xf32> to vector<40x16xf32>
      %31 = arith.addf %28, %30 : vector<40x16xf32>
      %cst_22 = arith.constant 0.000000e+00 : f32
      %32 = vector.broadcast %cst_22 : f32 to vector<40x16xf32>
      %33 = arith.maximumf %31, %32 : vector<40x16xf32>
      %34 = arith.truncf %33 : vector<40x16xf32> to vector<40x16xbf16>
      %c0_23 = arith.constant 0 : index
      %c0_24 = arith.constant 0 : index
      %35 = vector.load %arg10[%c0_23, %c0_24] : memref<40x16xbf16, #tpu.memory_space<vmem>>, vector<40x16xbf16>
      tpu.vector_store %arg10[%c0_23, %c0_24], %34 {strides = array<i32>} : memref<40x16xbf16, #tpu.memory_space<vmem>>, vector<40x16xbf16>,
      %c0_25 = arith.constant 0 : index
      %c0_26 = arith.constant 0 : index
      %36 = vector.load %arg3[%c0_25, %c0_26] : memref<12x40xf32, #tpu.memory_space<vmem>>, vector<12x40xf32>
      %c0_27 = arith.constant 0 : index
      %c0_28 = arith.constant 0 : index
      %37 = vector.load %arg6[%c0_27, %c0_28] : memref<40x40xf32, #tpu.memory_space<vmem>>, vector<40x40xf32>
      %cst_29 = arith.constant dense<0.000000e+00> : vector<12x40xf32>
      %38 = tpu.matmul %36, %37, %cst_29 {dimension_numbers = #tpu.dot_dimension_numbers<[1], [0], [0], [1], [0, 0, 1, 1], [], []>} : vector<12x40xf32>, vector<40x40xf32>, vector<12x40xf32> -> vector<12x40xf32>
      %c0_30 = arith.constant 0 : index
      %c0_31 = arith.constant 0 : index
      %39 = vector.load %arg7[%c0_30, %c0_31] : memref<1x40xf32, #tpu.memory_space<vmem>>, vector<1x40xf32>
      %40 = vector.broadcast %39 : vector<1x40xf32> to vector<12x40xf32>
      %41 = arith.addf %38, %40 : vector<12x40xf32>
      %cst_32 = arith.constant 0.000000e+00 : f32
      %42 = vector.broadcast %cst_32 : f32 to vector<12x40xf32>
      %43 = arith.maximumf %41, %42 : vector<12x40xf32>
      %c0_33 = arith.constant 0 : index
      %c0_34 = arith.constant 0 : index
      %44 = vector.load %arg11[%c0_33, %c0_34] : memref<12x40xf32, #tpu.memory_space<vmem>>, vector<12x40xf32>
      tpu.vector_store %arg11[%c0_33, %c0_34], %43 {strides = array<i32>} : memref<12x40xf32, #tpu.memory_space<vmem>>, vector<12x40xf32>,
    } else {
    }
    %c0 = arith.constant 0 : index
    %c0_1 = arith.constant 0 : index
    %3 = vector.load %arg8[%c0, %c0_1] : memref<160x40xbf16, #tpu.memory_space<vmem>>, vector<160x40xbf16>
    %c0_2 = arith.constant 0 : index
    %c0_3 = arith.constant 0 : index
    %4 = vector.load %arg10[%c0_2, %c0_3] : memref<40x16xbf16, #tpu.memory_space<vmem>>, vector<40x16xbf16>
    %cst = arith.constant dense<0.000000e+00> : vector<160x16xf32>
    %5 = tpu.matmul %3, %4, %cst {dimension_numbers = #tpu.dot_dimension_numbers<[1], [0], [0], [1], [0, 0, 1, 1], [], []>} : vector<160x40xbf16>, vector<40x16xbf16>, vector<160x16xf32> -> vector<160x16xf32>
    %6 = vector.shape_cast %5 : vector<160x16xf32> to vector<4x40x16xf32>
    %c0_4 = arith.constant 0 : index
    %c0_5 = arith.constant 0 : index
    %7 = vector.load %arg11[%c0_4, %c0_5] : memref<12x40xf32, #tpu.memory_space<vmem>>, vector<12x40xf32>
    %8 = vector.extract_strided_slice %7 {offsets = [0, 0], sizes = [6, 40], strides = [1, 1]} : vector<12x40xf32> to vector<6x40xf32>
    %9 = vector.extract_strided_slice %6 {offsets = [0, 0, 0], sizes = [4, 40, 8], strides = [1, 1, 1]} : vector<4x40x16xf32> to vector<4x40x8xf32>
    %10 = vector.shape_cast %8 : vector<6x40xf32> to vector<1x6x40xf32>
    %11 = vector.shape_cast %10 : vector<1x6x40xf32> to vector<1x6x40xf32>
    %12 = vector.broadcast %11 : vector<1x6x40xf32> to vector<4x6x40xf32>
    %cst_6 = arith.constant dense<0.000000e+00> : vector<4x6x8xf32>
    %13 = tpu.matmul %12, %9, %cst_6 {dimension_numbers = #tpu.dot_dimension_numbers<[2], [1], [1], [2], [0, 0, 0, 1, 1, 2], [0], [0]>} : vector<4x6x40xf32>, vector<4x40x8xf32>, vector<4x6x8xf32> -> vector<4x6x8xf32>
    %c0_7 = arith.constant 0 : index
    %c0_8 = arith.constant 0 : index
    %c0_9 = arith.constant 0 : index
    %c0_10 = arith.constant 0 : index
    %14 = vector.load %arg9[%c0_7, %c0_8, %c0_9, %c0_10] : memref<2x4x6x8xf32, #tpu.memory_space<vmem>>, vector<1x4x6x8xf32>
    %15 = vector.shape_cast %14 : vector<1x4x6x8xf32> to vector<4x6x8xf32>
    %16 = vector.shape_cast %13 : vector<4x6x8xf32> to vector<1x4x6x8xf32>
    tpu.vector_store %arg9[%c0_7, %c0_8, %c0_9, %c0_10], %16 {strides = array<i32>} : memref<2x4x6x8xf32, #tpu.memory_space<vmem>>, vector<1x4x6x8xf32>,
    %17 = vector.extract_strided_slice %7 {offsets = [6, 0], sizes = [6, 40], strides = [1, 1]} : vector<12x40xf32> to vector<6x40xf32>
    %18 = vector.extract_strided_slice %6 {offsets = [0, 0, 8], sizes = [4, 40, 8], strides = [1, 1, 1]} : vector<4x40x16xf32> to vector<4x40x8xf32>
    %19 = vector.shape_cast %17 : vector<6x40xf32> to vector<1x6x40xf32>
    %20 = vector.shape_cast %19 : vector<1x6x40xf32> to vector<1x6x40xf32>
    %21 = vector.broadcast %20 : vector<1x6x40xf32> to vector<4x6x40xf32>
    %cst_11 = arith.constant dense<0.000000e+00> : vector<4x6x8xf32>
    %22 = tpu.matmul %21, %18, %cst_11 {dimension_numbers = #tpu.dot_dimension_numbers<[2], [1], [1], [2], [0, 0, 0, 1, 1, 2], [0], [0]>} : vector<4x6x40xf32>, vector<4x40x8xf32>, vector<4x6x8xf32> -> vector<4x6x8xf32>
    %c1 = arith.constant 1 : index
    %c0_12 = arith.constant 0 : index
    %c0_13 = arith.constant 0 : index
    %c0_14 = arith.constant 0 : index
    %23 = vector.load %arg9[%c1, %c0_12, %c0_13, %c0_14] : memref<2x4x6x8xf32, #tpu.memory_space<vmem>>, vector<1x4x6x8xf32>
    %24 = vector.shape_cast %23 : vector<1x4x6x8xf32> to vector<4x6x8xf32>
    %25 = vector.shape_cast %22 : vector<4x6x8xf32> to vector<1x4x6x8xf32>
    tpu.vector_store %arg9[%c1, %c0_12, %c0_13, %c0_14], %25 {strides = array<i32>} : memref<2x4x6x8xf32, #tpu.memory_space<vmem>>, vector<1x4x6x8xf32>,
    return
  }
  func.func @transform_0(%arg0: i32, %arg1: i32) -> (i32, i32) {
    %c0_i32 = arith.constant 0 : i32
    %c0_i32_0 = arith.constant 0 : i32
    return %c0_i32, %arg0 : i32, i32
  }
  func.func @transform_1(%arg0: i32, %arg1: i32) -> (i32, i32) {
    %c0_i32 = arith.constant 0 : i32
    %c0_i32_0 = arith.constant 0 : i32
    return %arg0, %c0_i32 : i32, i32
  }
  func.func @transform_2(%arg0: i32, %arg1: i32) -> (i32, i32) {
    %c0_i32 = arith.constant 0 : i32
    %c0_i32_0 = arith.constant 0 : i32
    %c0_i32_1 = arith.constant 0 : i32
    return %c0_i32, %c0_i32_0 : i32, i32
  }
  func.func @transform_3(%arg0: i32, %arg1: i32) -> (i32, i32) {
    %c0_i32 = arith.constant 0 : i32
    %c0_i32_0 = arith.constant 0 : i32
    %c0_i32_1 = arith.constant 0 : i32
    return %c0_i32, %c0_i32_0 : i32, i32
  }
  func.func @transform_4(%arg0: i32, %arg1: i32) -> (i32, i32) {
    %c0_i32 = arith.constant 0 : i32
    %c0_i32_0 = arith.constant 0 : i32
    %c0_i32_1 = arith.constant 0 : i32
    return %c0_i32, %c0_i32_0 : i32, i32
  }
  func.func @transform_5(%arg0: i32, %arg1: i32) -> (i32, i32) {
    %c0_i32 = arith.constant 0 : i32
    %c0_i32_0 = arith.constant 0 : i32
    %c0_i32_1 = arith.constant 0 : i32
    return %c0_i32, %c0_i32_0 : i32, i32
  }
  func.func @transform_6(%arg0: i32, %arg1: i32) -> (i32, i32) {
    %c0_i32 = arith.constant 0 : i32
    %c0_i32_0 = arith.constant 0 : i32
    return %arg1, %c0_i32 : i32, i32
  }
  func.func @transform_7(%arg0: i32, %arg1: i32) -> (i32, i32, i32, i32) {
    %c0_i32 = arith.constant 0 : i32
    %c0_i32_0 = arith.constant 0 : i32
    %c0_i32_1 = arith.constant 0 : i32
    return %arg0, %arg1, %c0_i32, %c0_i32_0 : i32, i32, i32, i32
  }
}

</mosaic_0001>

<bundles_post_ra>
// kernel: tpu_custom_call.1
= control target key start
LH: loop header
LB: loop body
LE: loop exit
PB: predicated region body
PF: predicated region fallthrough
CT: control target
= control target key end

     0   :  { %v1643_v0 = vmov 0.0|0.0   ;;  %vm1644_vm0 = vmmov 0   ;;  %v1645_v4 = vmov 0.0   ;;  %v1646_v7 = vmov 0   ;;  %s1920_s0 = inlined_call_operand.vmem [shape: f32[48,16], index: 0, kind: input, shape index: {}]   ;;  %s1921_s3 = inlined_call_operand.vmem [shape: f32[40,1], index: 3, kind: input, shape index: {}]   ;;  %s1922_s2 = inlined_call_operand.vmem [shape: f32[40,48], index: 2, kind: input, shape index: {}]   ;;  %s1923_s4 = inlined_call_operand.vmem [shape: f32[40,40], index: 4, kind: input, shape index: {}]   ;;  %s1924_s1 = inlined_call_operand.vmem [shape: f32[12,40], index: 1, kind: input, shape index: {}]   ;;  %s1925_s6 = inlined_call_operand.vmem [shape: bf16[160,40], index: 6, kind: input, shape index: {}]   ;;  %s1926_s5 = inlined_call_operand.vmem [shape: f32[1,40], index: 5, kind: input, shape index: {}]   ;;  %s1927_s7 = inlined_call_operand.vmem [shape: f32[2,4,6,8], index: 7, kind: output, shape index: {}]  }
   0x1   :  { %1517 = vmatprep.subr.bf16.mxu0 %v1643_v0  ;;  %v36_v1 = vld [vmem:[%s1920_s0] sm:$0xff]  ;;  %v37_v2 = vld [vmem:[%s1920_s0 + $0x8] sm:$0xff]  ;;  %v38_v3 = vld [vmem:[%s1920_s0 + $0x10] sm:$0xff]  ;;  %1359 = vmatprep.mubr.msk.f32.mxu0 %vm1644_vm0, %v1645_v4  ;;  %vm72_vm1 = vcmask 392192   ;;  %vm224_vm2 = vcmask 326656   ;;  %vm204_vm3 = vcmask 125952  }
   0x2   :  { %v1518_v5 = vpack.c.bf16 %v37_v2, %v36_v1  ;;  %v39_v6 = vld [vmem:[%s1920_s0 + $0x18] sm:$0xff]  ;;  %1588 = vset.pattern.permute.xlu0 %v1646_v7  ;;  %1589 = vset.pattern.permute.xlu1 %v1646_v7  ;;  %v42_v9 = vld [vmem:[%s1921_s3] sm:$0xff]  ;;  %v41_v11 = vld [vmem:[%s1920_s0 + $0x28] sm:$0xff]  ;;  %vm432_vm4 = vcmask 1043456   ;;  %vm309_vm5 = vcmask 322560   ;;  %vm840_vm6 = vcmask 1041408  }
   0x3   :  { %v1521_v8 = vpack.c.bf16 %v39_v6, %v38_v3  ;;  %v40_v10 = vld [vmem:[%s1920_s0 + $0x20] sm:$0xff]  ;;  %49 = vperm.xlu0 %1588, %v42_v9   ;;  %v44_v12 = vld [vmem:[%s1921_s3 + $0x10] sm:$0xff]  ;;  %v43_v13 = vld [vmem:[%s1921_s3 + $0x8] sm:$0xff]  ;;  %vm834_vm7 = vcmask 62464  }
   0x4   :  { %1519 = vmatpush3.bf16.msra.mxu0 %v1518_v5  ;;  %59 = vperm.xlu1 %1589, %v44_v12   ;;  %v45_v14 = vld [vmem:[%s1921_s3 + $0x18] sm:$0xff]  ;;  %v1524_v15 = vpack.c.bf16 %v41_v11, %v40_v10  ;;  %v46_v16 = vld [vmem:[%s1921_s3 + $0x20] sm:$0xff]  ;;  %v32_v18 = vld [vmem:[%s1922_s2 + $0x8] sm:$0xff] }
   0x5   :  { %1520 = vmatprep.subr.bf16.mxu0 %v1643_v0  ;;  %v31_v17 = vld [vmem:[%s1922_s2] sm:$0xff]  ;;  %v33_v19 = vld [vmem:[%s1922_s2 + $0x10] sm:$0xff]  ;;  %v34_v20 = vld [vmem:[%s1922_s2 + $0x18] sm:$0xff] }
   0x6   :  { %v35_v21 = vld [vmem:[%s1922_s2 + $0x20] sm:$0xff]  ;;  %v213_v23 = vld [vmem:[%s1923_s4 + $0x8] sm:$0xff]  ;;  %v214_v25 = vld [vmem:[%s1923_s4 + $0x10] sm:$0xff] }
   0x7   :  { %54 = vperm.xlu0 %1588, %v43_v13   ;;  %v212_v22 = vld [vmem:[%s1923_s4] sm:$0xff]  ;;  %v215_v26 = vld [vmem:[%s1923_s4 + $0x18] sm:$0xff]  ;;  %v211_v30 = vld [vmem:[%s1924_s1 + $0x8] sm:$0xf] }
   0x8   :  { %1522 = vmatpush3.bf16.msra.mxu0 %v1521_v8  ;;  %64 = vperm.xlu1 %1589, %v45_v14   ;;  %v1526_v24 = vpack.c.bf16 %v213_v23, %v212_v22  ;;  %v1530_v27 = vpack.c.bf16 %v215_v26, %v214_v25  ;;  %v216_v28 = vld [vmem:[%s1923_s4 + $0x20] sm:$0xff]  ;;  %v1634_v3 = vld [vmem:[%s1925_s6 + $0x8] sm:$0xff]   ;;  %v1635_v5 = vld [vmem:[%s1925_s6 + $0x10] sm:$0xff]  }
   0x9   :  { %1523 = vmatprep.subr.bf16.mxu0 %v1643_v0  ;;  %v210_v29 = vld [vmem:[%s1924_s1] sm:$0xff]  ;;  %v1636_v6 = vld [vmem:[%s1925_s6 + $0x18] sm:$0xff]   ;;  %v1638_v8 = vld [vmem:[%s1925_s6 + $0x28] sm:$0xff]  }
   0xa   :  { %1527 = vmatprep.subr.bf16.mxu1 %v1526_v24  ;;  %1384 = vmatprep.mubr.msk.f32.mxu1 %vm224_vm2, %v210_v29  ;;  %v1633_v31 = vld [vmem:[%s1925_s6] sm:$0xff]   ;;  %v1639_v9 = vld [vmem:[%s1925_s6 + $0x30] sm:$0xff]   ;;  %v1640_v10 = vld [vmem:[%s1925_s6 + $0x38] sm:$0xff]  }
   0xb   :  { %69 = vperm.xlu0 %1588, %v46_v16   ;;  %1529 = vmatpush3.bf16.msra.mxu1 %v1526_v24  ;;  %v1637_v7 = vld [vmem:[%s1925_s6 + $0x20] sm:$0xff]   ;;  %v1642_v12 = vld [vmem:[%s1925_s6 + $0x48] sm:$0xff]  }
   0xc   :  { %1525 = vmatpush3.bf16.msra.mxu0 %v1524_v15  ;;  %1531 = vmatprep.subr.bf16.mxu1 %v1530_v27  ;;  %v1641_v11 = vld [vmem:[%s1925_s6 + $0x40] sm:$0xff]   ;;  %s1647_s6 = smov 120  }
   0xd   :  { %1534 = vmatprep.subr.bf16.mxu0 %v1643_v0  ;;  %v1225_v13 = vld [vmem:[%s1926_s5] ss:$0 sm:$0xff] }
   0xf   :  { %1360 = vmatmul.mubr.msk.f32.vlgmr.msra.gmra.mrb[0].mxu0 %vm72_vm1, %v31_v17  ;;  %1533 = vmatpush3.bf16.msra.mxu1 %v1530_v27 }
  0x10   :  { %1362 = vmatprep.mubr.msk.f32.mxu0 %vm1644_vm0, %v1645_v4  ;;  %1382 = vmatprep.subr.mxu1 %v216_v28 }
  0x13   :  { %1363 = vmatmul.mubr.msk.f32.gmra.mrb[2].mxu0 %vm72_vm1, %v32_v18  ;;  %1383 = vmatpush3.msra.mxu1 %v216_v28 }
  0x14   :  { %1365 = vmatprep.mubr.msk.f32.mxu0 %vm1644_vm0, %v1645_v4  ;;  %1385 = vmatmul.mubr.msk.f32.vlgmr.msra.gmra.mrb[0].mxu1 %vm224_vm2, %v211_v30 }
  0x15   :  { %1393 = vmatprep.mubr.msk.bf16.mxu1 %vm224_vm2, %v1633_v31 }
  0x17   :  { %1366 = vmatmul.mubr.msk.f32.gmra.mrb[4].mxu0 %vm72_vm1, %v33_v19 }
  0x18   :  { %1368 = vmatprep.mubr.msk.f32.mxu0 %vm1644_vm0, %v1645_v4 }
  0x1b   :  { %1369 = vmatmul.mubr.msk.f32.gmra.mrb[6].mxu0 %vm72_vm1, %v34_v20 }
  0x1c   :  { %1371 = vmatprep.mubr.msk.f32.mxu0 %vm1644_vm0, %v1645_v4 }
  0x1f   :  { %1372 = vmatmul.mubr.msk.f32.gmra.mrb[8].mxu0 %vm72_vm1, %v35_v21 }
  0x20   :  { %1423 = vmatprep.mubr.msk.f32.mxu0 %vm1644_vm0, %v1645_v4 }
  0x82   :  { %v50_v32 = vpop.permute.xlu0 %49 }
  0x83   :  { %v60_v42 = vpop.permute.xlu1 %59 }
  0x86   :  { %v55_v37 = vpop.permute.xlu0 %54 }
  0x87   :  { %v65_v49 = vpop.permute.xlu1 %64 }
  0x8a   :  { %v70_v55 = vpop.permute.xlu0 %69 }
  0xe2   :  { %v154_v33 = vpop.f32.mrb[0].mxu0 }
  0xe3   :  { %v155_v34 = vadd.f32 %v154_v33, %v50_v32  ;;  %v1361_v35 = vpop.f32.mrb[1].mxu0 }
  0xe5   :  { %v178_v36 = vmax.f32 %v155_v34, 0.0 }
  0xe6   :  { %v159_v38 = vpop.f32.mrb[2].mxu0 }
  0xe7   :  { %v1263_v39 = vpack.c.bf16 %v178_v36, %v178_v36  ;;  %v160_v40 = vadd.f32 %v159_v38, %v55_v37  ;;  %v1364_v41 = vpop.f32.mrb[3].mxu0  ;;  %v1386_v14 = vpop.f32.mrb[0].mxu1 }
  0xe8   :  { %v303_v15 = vadd.f32 %v1386_v14, %v1225_v13  ;;  %v297_v16 = vpop.f32.mrb[1].mxu1 }
  0xe9   :  { %205 = vst.msk [vmem:[#allocation2] sm:$0xf] %vm204_vm3, %v1263_v39  ;;  %v179_v43 = vmax.f32 %v160_v40, 0.0  ;;  %v298_v17 = vadd.f32 %v1225_v13, %v297_v16 }
  0xea   :  { %v164_v44 = vpop.f32.mrb[4].mxu0  ;;  %v307_v18 = vmax.f32 %v303_v15, 0.0 }
  0xeb   :  { %v1264_v45 = vpack.c.bf16 %v179_v43, %v179_v43  ;;  %v165_v46 = vadd.f32 %v164_v44, %v60_v42  ;;  %v1367_v47 = vpop.f32.mrb[5].mxu0  ;;  %v306_v19 = vmax.f32 %v298_v17, 0.0 }
  0xec   :  { %310 = vst.msk [vmem:[#allocation3 + $0x8] sm:$0xf] %vm309_vm5, %v307_v18 }
  0xed   :  { %206 = vst.msk [vmem:[#allocation2 + $0x4] sm:$0xf] %vm204_vm3, %v1264_v45  ;;  %v180_v48 = vmax.f32 %v165_v46, 0.0 }
  0xee   :  { %v169_v50 = vpop.f32.mrb[6].mxu0  ;;  %308 = vst.msk [vmem:[#allocation3] sm:$0xff] %vm224_vm2, %v306_v19 }
  0xef   :  { %v1265_v51 = vpack.c.bf16 %v180_v48, %v180_v48  ;;  %v170_v52 = vadd.f32 %v169_v50, %v65_v49  ;;  %v1370_v53 = vpop.f32.mrb[7].mxu0 }
  0xf1   :  { %207 = vst.msk [vmem:[#allocation2 + $0x8] sm:$0xf] %vm204_vm3, %v1265_v51  ;;  %v181_v54 = vmax.f32 %v170_v52, 0.0 }
  0xf2   :  { %v174_v56 = vpop.f32.mrb[8].mxu0 }
  0xf3   :  { %v1266_v57 = vpack.c.bf16 %v181_v54, %v181_v54  ;;  %v175_v58 = vadd.f32 %v174_v56, %v70_v55  ;;  %v1373_v59 = vpop.f32.mrb[9].mxu0 }
  0xf4   :  { %v1630_v60 = vld [vmem:[#allocation2] sm:$0xff]  }
  0xf5   :  { %208 = vst.msk [vmem:[#allocation2 + $0xc] sm:$0xf] %vm204_vm3, %v1266_v57  ;;  %v182_v61 = vmax.f32 %v175_v58, 0.0  ;;  %1387 = vmatprep.subr.bf16.mxu1 %v1630_v60  ;;  %v1831_v34 = vld [vmem:[#allocation3] sm:$0xff] }
  0xf6   :  { %1388 = vmatpush3.bf16.msra.mxu1 %v1630_v60 }
  0xf7   :  { %v1267_v62 = vpack.c.bf16 %v182_v61, %v182_v61 }
  0xf9   :  { %209 = vst.msk [vmem:[#allocation2 + $0x10] sm:$0xf] %vm204_vm3, %v1267_v62 }
  0xfc   :  { %v1631_v63 = vld [vmem:[#allocation2 + $0x8] sm:$0xff]  }
  0xfd   :  { %1389 = vmatprep.subr.bf16.mxu1 %v1631_v63 }
  0xfe   :  { %1390 = vmatpush3.bf16.msra.mxu1 %v1631_v63 }
 0x100   :  { %v1632_v1 = vld [vmem:[#allocation2 + $0x10] ss:$0 sps:$4 sm:$0xff]  }
 0x101   :  { %1582 = vmatprep.subr.msk.bf16.mxu1 %vm432_vm4, %v1632_v1  ;;  %v434_v2 = vsel %vm432_vm4, %v1632_v1, 0  ;;  %v550_v1 = vld [vmem:[#allocation3 + $0x8] sm:$0xf] }
 0x102   :  { %1392 = vmatpush3.bf16.msra.mxu1 %v434_v2 }
 0x103   :  { %1558 = vmatprep.subr.bf16.mxu1 %v1643_v0 }
 0x105   :  { %1394 = vmatmul.mubr.msk.bf16.vlgmr.msra.gmra.mrb[4].mxu1 %vm224_vm2, %v1634_v3 }
 0x106   :  { %1397 = vmatprep.mubr.msk.bf16.mxu1 %vm224_vm2, %v1635_v5 }
 0x10d   :  { %1398 = vmatmul.mubr.msk.bf16.gmra.mrb[8].mxu1 %vm224_vm2, %v1636_v6 }
 0x10e   :  { %1401 = vmatprep.mubr.msk.bf16.mxu1 %vm224_vm2, %v1637_v7  ;;  %v841_v7 = vrot.slane %v1831_v34, 6 }
 0x115   :  { %1402 = vmatmul.mubr.msk.bf16.gmra.mrb[12].mxu1 %vm224_vm2, %v1638_v8  ;;  %v842_v8 = vrot.slane %v550_v1, 6 }
 0x116   :  { %1405 = vmatprep.mubr.msk.bf16.mxu1 %vm224_vm2, %v1639_v9 }
 0x11d   :  { %1406 = vmatmul.mubr.msk.bf16.gmra.mrb[16].mxu1 %vm224_vm2, %v1640_v10 }
 0x11e   :  { %1409 = vmatprep.mubr.msk.bf16.mxu1 %vm224_vm2, %v1641_v11  ;;  %v843_v11 = vsel %vm840_vm6, %v841_v7, %v842_v8 }
 0x125   :  { %1410 = vmatmul.mubr.msk.bf16.gmra.mrb[20].mxu1 %vm224_vm2, %v1642_v12 }
 0x126   :  { %1475 = vmatprep.mubr.msk.f32.mxu1 %vm1644_vm0, %v1645_v4 }
 0x1d8   :  { %v1395_v20 = vpop.f32.mrb[4].mxu1 }
 0x1d9   :  { %v470_v21 = vpop.f32.mrb[5].mxu1 }
 0x1da   :  { %v1396_v22 = vpop.f32.mrb[6].mxu1 }
 0x1db   :  { %v1595_v23 = vpack.i.bf16 %v1396_v22, %v1395_v20  ;;  %v1538_v24 = vpack.c.bf16 %v1396_v22, %v1395_v20  ;;  %v473_v25 = vpop.f32.mrb[7].mxu1 }
 0x1dc   :  { %v1590_v26 = vpack.i.bf16 %v473_v25, %v470_v21  ;;  %v1535_v27 = vpack.c.bf16 %v473_v25, %v470_v21 }
 0x1de   :  { %1591 = vrot.lane.b32.xlu1 %v1590_v26, %s1647_s6  ;;  %1536 = vmatpush3.bf16.msra.mxu0 %v1535_v27 }
 0x1df   :  { %1537 = vmatprep.subr.bf16.mxu0 %v1643_v0 }
 0x1e0   :  { %v1399_v28 = vpop.f32.mrb[8].mxu1 }
 0x1e1   :  { %v486_v29 = vpop.f32.mrb[9].mxu1 }
 0x1e2   :  { %1596 = vrot.lane.b32.xlu1 %v1595_v23, %s1647_s6  ;;  %1539 = vmatpush3.bf16.msra.mxu0 %v1538_v24  ;;  %v1400_v30 = vpop.f32.mrb[10].mxu1 }
 0x1e3   :  { %v489_v31 = vpop.f32.mrb[11].mxu1  ;;  %1421 = vmatprep.subr.mxu0 %v1645_v4 }
 0x1e4   :  { %v1600_v32 = vpack.i.bf16 %v1399_v28, %v489_v31  ;;  %v1541_v33 = vpack.c.bf16 %v1399_v28, %v489_v31 }
 0x1e6   :  { %1422 = vmatpush3.msra.mxu0 %v486_v29  ;;  %1601 = vrot.lane.b32.xlu0 %v1600_v32, %s1647_s6 }
 0x1e7   :  { %1424 = vmatmul.mubr.msk.f32.vlgmr.msra.gmra.mrb[10].mxu0 %vm224_vm2, %v1831_v34  ;;  %1540 = vmatprep.subr.bf16.mxu0 %v1643_v0 }
 0x1e8   :  { %v1403_v35 = vpop.f32.mrb[12].mxu1  ;;  %1542 = vmatpush3.bf16.msra.mxu0 %v1541_v33  ;;  %857 = vrot.lane.b32.xlu1 %v486_v29, %s1647_s6 }
 0x1e9   :  { %v502_v36 = vpop.f32.mrb[13].mxu1  ;;  %1543 = vmatprep.subr.bf16.mxu0 %v1643_v0  ;;  %1436 = vmatprep.mubr.msk.f32.mxu0 %vm1644_vm0, %v1645_v4 }
 0x1ea   :  { %v1605_v37 = vpack.i.bf16 %v502_v36, %v1400_v30  ;;  %v1544_v38 = vpack.c.bf16 %v502_v36, %v1400_v30  ;;  %v1404_v39 = vpop.f32.mrb[14].mxu1 }
 0x1eb   :  { %v1610_v40 = vpack.i.bf16 %v1404_v39, %v1403_v35  ;;  %v1547_v41 = vpack.c.bf16 %v1404_v39, %v1403_v35  ;;  %v505_v42 = vpop.f32.mrb[15].mxu1 }
 0x1ec   :  { %1606 = vrot.lane.b32.xlu0 %v1605_v37, %s1647_s6  ;;  %1545 = vmatpush3.bf16.msra.mxu0 %v1544_v38 }
 0x1ed   :  { %1434 = vmatprep.subr.mxu0 %v1645_v4  ;;  %1611 = vrot.lane.b32.xlu1 %v1610_v40, %s1647_s6 }
 0x1f0   :  { %v1407_v43 = vpop.f32.mrb[16].mxu1  ;;  %1435 = vmatpush3.msra.mxu0 %v505_v42  ;;  %949 = vrot.lane.b32.xlu0 %v505_v42, %s1647_s6 }
 0x1f1   :  { %v518_v44 = vpop.f32.mrb[17].mxu1  ;;  %1437 = vmatmul.mubr.msk.f32.vlgmr.msra.gmra.mrb[12].mxu0 %vm224_vm2, %v1831_v34  ;;  %1546 = vmatprep.subr.bf16.mxu0 %v1643_v0 }
 0x1f2   :  { %v1408_v45 = vpop.f32.mrb[18].mxu1  ;;  %1548 = vmatpush3.bf16.msra.mxu0 %v1547_v41  ;;  %1449 = vmatprep.mubr.msk.f32.mxu0 %vm1644_vm0, %v1645_v4 }
 0x1f3   :  { %v521_v46 = vpop.f32.mrb[19].mxu1  ;;  %1549 = vmatprep.subr.bf16.mxu0 %v1643_v0 }
 0x1f4   :  { %v1615_v47 = vpack.i.bf16 %v521_v46, %v518_v44  ;;  %v1550_v48 = vpack.c.bf16 %v521_v46, %v518_v44 }
 0x1f6   :  { %1616 = vrot.lane.b32.xlu1 %v1615_v47, %s1647_s6  ;;  %1551 = vmatpush3.bf16.msra.mxu0 %v1550_v48 }
 0x1f7   :  { %1447 = vmatprep.subr.mxu0 %v1645_v4 }
 0x1f8   :  { %v1411_v49 = vpop.f32.mrb[20].mxu1 }
 0x1f9   :  { %v534_v50 = vpop.f32.mrb[21].mxu1 }
 0x1fa   :  { %v1620_v51 = vpack.i.bf16 %v534_v50, %v1408_v45  ;;  %v1553_v52 = vpack.c.bf16 %v534_v50, %v1408_v45  ;;  %1448 = vmatpush3.msra.mxu0 %v1407_v43  ;;  %1039 = vrot.lane.b32.xlu1 %v1407_v43, %s1647_s6  ;;  %v1412_v53 = vpop.f32.mrb[22].mxu1 }
 0x1fb   :  { %1450 = vmatmul.mubr.msk.f32.vlgmr.msra.gmra.mrb[14].mxu0 %vm224_vm2, %v1831_v34  ;;  %1552 = vmatprep.subr.bf16.mxu0 %v1643_v0  ;;  %v537_v54 = vpop.f32.mrb[23].mxu1 }
 0x1fc   :  { %1621 = vrot.lane.b32.xlu0 %v1620_v51, %s1647_s6  ;;  %1554 = vmatpush3.bf16.msra.mxu0 %v1553_v52  ;;  %v1625_v55 = vpack.i.bf16 %v1411_v49, %v537_v54  ;;  %v1556_v56 = vpack.c.bf16 %v1411_v49, %v537_v54 }
 0x1fd   :  { %1555 = vmatprep.subr.bf16.mxu0 %v1643_v0  ;;  %1462 = vmatprep.mubr.msk.f32.mxu0 %vm1644_vm0, %v1645_v4 }
 0x200   :  { %1626 = vrot.lane.b32.xlu0 %v1625_v55, %s1647_s6  ;;  %1557 = vmatpush3.bf16.msra.mxu0 %v1556_v56 }
 0x201   :  { %1460 = vmatprep.subr.mxu0 %v1645_v4 }
 0x204   :  { %1129 = vrot.lane.b32.xlu0 %v1412_v53, %s1647_s6  ;;  %1461 = vmatpush3.msra.mxu0 %v1412_v53 }
 0x205   :  { %1463 = vmatmul.mubr.msk.f32.vlgmr.msra.gmra.mrb[16].mxu0 %vm224_vm2, %v1831_v34  ;;  %1564 = vmatprep.subr.bf16.mxu0 %v1643_v0 }
 0x206   :  { %1488 = vmatprep.mubr.msk.f32.mxu0 %vm1644_vm0, %v1645_v4 }
 0x250   :  { %v1592_v57 = vpop.permute.xlu1 %1591 }
 0x251   :  { %v1594_v58 = vunpack.i.h.bf16 %v1592_v57  ;;  %v1593_v59 = vunpack.i.l.bf16 %v1592_v57 }
 0x253   :  { %v1559_v60 = vpack.c.bf16 %v1594_v58, %v1593_v59 }
 0x254   :  { %v1597_v61 = vpop.permute.xlu1 %1596 }
 0x255   :  { %v1599_v62 = vunpack.i.h.bf16 %v1597_v61  ;;  %v1598_v63 = vunpack.i.l.bf16 %v1597_v61  ;;  %1560 = vmatpush3.bf16.msra.mxu1 %v1559_v60 }
 0x256   :  { %1561 = vmatprep.subr.bf16.mxu1 %v1643_v0 }
 0x257   :  { %v1562_v2 = vpack.c.bf16 %v1599_v62, %v1598_v63 }
 0x258   :  { %v1602_v3 = vpop.permute.xlu0 %1601 }
 0x259   :  { %1563 = vmatpush3.bf16.msra.mxu1 %v1562_v2  ;;  %v1604_v5 = vunpack.i.h.bf16 %v1602_v3  ;;  %v1603_v6 = vunpack.i.l.bf16 %v1602_v3 }
 0x25a   :  { %1473 = vmatprep.subr.mxu1 %v1645_v4  ;;  %v858_v10 = vpop.permute.xlu1 %857 }
 0x25b   :  { %v1565_v9 = vpack.c.bf16 %v1604_v5, %v1603_v6 }
 0x25d   :  { %1474 = vmatpush3.msra.mxu1 %v858_v10  ;;  %1566 = vmatpush3.bf16.msra.mxu0 %v1565_v9 }
 0x25e   :  { %1476 = vmatmul.mubr.msk.f32.vlgmr.msra.gmra.mrb[2].mxu1 %vm224_vm2, %v843_v11  ;;  %v1607_v12 = vpop.permute.xlu0 %1606  ;;  %1567 = vmatprep.subr.bf16.mxu0 %v1643_v0 }
 0x25f   :  { %v1609_v13 = vunpack.i.h.bf16 %v1607_v12  ;;  %v1608_v14 = vunpack.i.l.bf16 %v1607_v12  ;;  %v1612_v15 = vpop.permute.xlu1 %1611  ;;  %1570 = vmatprep.subr.bf16.mxu1 %v1643_v0  ;;  %1501 = vmatprep.mubr.msk.f32.mxu1 %vm1644_vm0, %v1645_v4 }
 0x260   :  { %v1614_v16 = vunpack.i.h.bf16 %v1612_v15  ;;  %v1613_v17 = vunpack.i.l.bf16 %v1612_v15 }
 0x261   :  { %v1568_v18 = vpack.c.bf16 %v1609_v13, %v1608_v14 }
 0x262   :  { %v1571_v19 = vpack.c.bf16 %v1614_v16, %v1613_v17  ;;  %v950_v20 = vpop.permute.xlu0 %949 }
 0x263   :  { %1569 = vmatpush3.bf16.msra.mxu0 %v1568_v18 }
 0x264   :  { %1486 = vmatprep.subr.mxu0 %v1645_v4  ;;  %1572 = vmatpush3.bf16.msra.mxu1 %v1571_v19 }
 0x265   :  { %1573 = vmatprep.subr.bf16.mxu1 %v1643_v0 }
 0x267   :  { %1487 = vmatpush3.msra.mxu0 %v950_v20 }
 0x268   :  { %v1617_v21 = vpop.permute.xlu1 %1616  ;;  %1489 = vmatmul.mubr.msk.f32.vlgmr.msra.gmra.mrb[18].mxu0 %vm224_vm2, %v843_v11  ;;  %1576 = vmatprep.subr.bf16.mxu0 %v1643_v0 }
 0x269   :  { %v1619_v22 = vunpack.i.h.bf16 %v1617_v21  ;;  %v1618_v23 = vunpack.i.l.bf16 %v1617_v21  ;;  %1514 = vmatprep.mubr.msk.f32.mxu0 %vm1644_vm0, %v1645_v4 }
 0x26b   :  { %v1574_v24 = vpack.c.bf16 %v1619_v22, %v1618_v23 }
 0x26c   :  { %v1040_v28 = vpop.permute.xlu1 %1039 }
 0x26d   :  { %1575 = vmatpush3.bf16.msra.mxu1 %v1574_v24 }
 0x26e   :  { %v1622_v25 = vpop.permute.xlu0 %1621  ;;  %1499 = vmatprep.subr.mxu1 %v1645_v4 }
 0x26f   :  { %v1624_v26 = vunpack.i.h.bf16 %v1622_v25  ;;  %v1623_v27 = vunpack.i.l.bf16 %v1622_v25 }
 0x271   :  { %v1577_v29 = vpack.c.bf16 %v1624_v26, %v1623_v27  ;;  %1500 = vmatpush3.msra.mxu1 %v1040_v28 }
 0x272   :  { %1502 = vmatmul.mubr.msk.f32.vlgmr.msra.gmra.mrb[24].mxu1 %vm224_vm2, %v843_v11  ;;  %v1627_v30 = vpop.permute.xlu0 %1626 }
 0x273   :  { %v1629_v31 = vunpack.i.h.bf16 %v1627_v30  ;;  %v1628_v32 = vunpack.i.l.bf16 %v1627_v30  ;;  %1578 = vmatpush3.bf16.msra.mxu0 %v1577_v29 }
 0x274   :  { %1579 = vmatprep.subr.bf16.mxu0 %v1643_v0 }
 0x275   :  { %v1580_v33 = vpack.c.bf16 %v1629_v31, %v1628_v32 }
 0x276   :  { %v1130_v34 = vpop.permute.xlu0 %1129 }
 0x277   :  { %1581 = vmatpush3.bf16.msra.mxu0 %v1580_v33 }
 0x278   :  { %1512 = vmatprep.subr.mxu0 %v1645_v4 }
 0x27b   :  { %1513 = vmatpush3.msra.mxu0 %v1130_v34 }
 0x27c   :  { %1515 = vmatmul.mubr.msk.f32.vlgmr.msra.gmra.mrb[20].mxu0 %vm224_vm2, %v843_v11 }
 0x2ba   :  { %v620_v35 = vpop.f32.mrb[10].mxu0 }
 0x2bb   :  { %835 = vst.msk [vmem:[%s1927_s7] sm:$0x3f] %vm834_vm7, %v620_v35  ;;  %v1425_v36 = vpop.f32.mrb[11].mxu0 }
 0x2c4   :  { %v690_v37 = vpop.f32.mrb[12].mxu0 }
 0x2c5   :  { %836 = vst.msk [vmem:[%s1927_s7 + $0x8] sm:$0x3f] %vm834_vm7, %v690_v37  ;;  %v1438_v0 = vpop.f32.mrb[13].mxu0 }
 0x2ce   :  { %v760_v4 = vpop.f32.mrb[14].mxu0 }
 0x2cf   :  { %837 = vst.msk [vmem:[%s1927_s7 + $0x10] sm:$0x3f] %vm834_vm7, %v760_v4  ;;  %v1451_v38 = vpop.f32.mrb[15].mxu0 }
 0x2d8   :  { %v830_v39 = vpop.f32.mrb[16].mxu0 }
 0x2d9   :  { %838 = vst.msk [vmem:[%s1927_s7 + $0x18] sm:$0x3f] %vm834_vm7, %v830_v39  ;;  %v1464_v40 = vpop.f32.mrb[17].mxu0 }
 0x331   :  { %v932_v41 = vpop.f32.mrb[2].mxu1 }
 0x332   :  { %1259 = vst.msk [vmem:[%s1927_s7 + $0x20] sm:$0x3f] %vm834_vm7, %v932_v41  ;;  %v1477_v42 = vpop.f32.mrb[3].mxu1 }
 0x33b   :  { %v1022_v43 = vpop.f32.mrb[18].mxu0 }
 0x33c   :  { %1260 = vst.msk [vmem:[%s1927_s7 + $0x28] sm:$0x3f] %vm834_vm7, %v1022_v43  ;;  %v1490_v44 = vpop.f32.mrb[19].mxu0 }
 0x345   :  { %v1112_v45 = vpop.f32.mrb[24].mxu1 }
 0x346   :  { %1261 = vst.msk [vmem:[%s1927_s7 + $0x30] sm:$0x3f] %vm834_vm7, %v1112_v45  ;;  %v1503_v46 = vpop.f32.mrb[25].mxu1 }
 0x34f   :  { %v1202_v47 = vpop.f32.mrb[20].mxu0 }
 0x350   :  { %1262 = vst.msk [vmem:[%s1927_s7 + $0x38] sm:$0x3f] %vm834_vm7, %v1202_v47  ;;  %v1516_v48 = vpop.f32.mrb[21].mxu0 }

// kernel: tpu_custom_call.1
= control target key start
LH: loop header
LB: loop body
LE: loop exit
PB: predicated region body
PF: predicated region fallthrough
CT: control target
= control target key end

     0   :  { %v1643_v0 = vmov 0.0|0.0   ;;  %vm1644_vm0 = vmmov 0   ;;  %v1645_v4 = vmov 0.0   ;;  %v1646_v7 = vmov 0   ;;  %s1920_s0 = inlined_call_operand.vmem [shape: f32[48,16], index: 0, kind: input, shape index: {}]   ;;  %s1921_s3 = inlined_call_operand.vmem [shape: f32[40,1], index: 3, kind: input, shape index: {}]   ;;  %s1922_s2 = inlined_call_operand.vmem [shape: f32[40,48], index: 2, kind: input, shape index: {}]   ;;  %s1923_s4 = inlined_call_operand.vmem [shape: f32[40,40], index: 4, kind: input, shape index: {}]   ;;  %s1924_s1 = inlined_call_operand.vmem [shape: f32[12,40], index: 1, kind: input, shape index: {}]   ;;  %s1925_s6 = inlined_call_operand.vmem [shape: bf16[160,40], index: 6, kind: input, shape index: {}]   ;;  %s1926_s5 = inlined_call_operand.vmem [shape: f32[1,40], index: 5, kind: input, shape index: {}]   ;;  %s1927_s7 = inlined_call_operand.vmem [shape: f32[2,4,6,8], index: 7, kind: output, shape index: {}]  }
   0x1   :  { %1517 = vmatprep.subr.bf16.mxu0 %v1643_v0  ;;  %v36_v1 = vld [vmem:[%s1920_s0] sm:$0xff]  ;;  %v37_v2 = vld [vmem:[%s1920_s0 + $0x8] sm:$0xff]  ;;  %v38_v3 = vld [vmem:[%s1920_s0 + $0x10] sm:$0xff]  ;;  %1359 = vmatprep.mubr.msk.f32.mxu0 %vm1644_vm0, %v1645_v4  ;;  %vm72_vm1 = vcmask 392192   ;;  %vm224_vm2 = vcmask 326656   ;;  %vm204_vm3 = vcmask 125952  }
   0x2   :  { %v1518_v5 = vpack.c.bf16 %v37_v2, %v36_v1  ;;  %v39_v6 = vld [vmem:[%s1920_s0 + $0x18] sm:$0xff]  ;;  %1588 = vset.pattern.permute.xlu0 %v1646_v7  ;;  %1589 = vset.pattern.permute.xlu1 %v1646_v7  ;;  %v42_v9 = vld [vmem:[%s1921_s3] sm:$0xff]  ;;  %v41_v11 = vld [vmem:[%s1920_s0 + $0x28] sm:$0xff]  ;;  %vm432_vm4 = vcmask 1043456   ;;  %vm309_vm5 = vcmask 322560   ;;  %vm840_vm6 = vcmask 1041408  }
   0x3   :  { %v1521_v8 = vpack.c.bf16 %v39_v6, %v38_v3  ;;  %v40_v10 = vld [vmem:[%s1920_s0 + $0x20] sm:$0xff]  ;;  %49 = vperm.xlu0 %1588, %v42_v9   ;;  %v44_v12 = vld [vmem:[%s1921_s3 + $0x10] sm:$0xff]  ;;  %v43_v13 = vld [vmem:[%s1921_s3 + $0x8] sm:$0xff]  ;;  %vm834_vm7 = vcmask 62464  }
   0x4   :  { %1519 = vmatpush3.bf16.msra.mxu0 %v1518_v5  ;;  %59 = vperm.xlu1 %1589, %v44_v12   ;;  %v45_v14 = vld [vmem:[%s1921_s3 + $0x18] sm:$0xff]  ;;  %v1524_v15 = vpack.c.bf16 %v41_v11, %v40_v10  ;;  %v46_v16 = vld [vmem:[%s1921_s3 + $0x20] sm:$0xff]  ;;  %v32_v18 = vld [vmem:[%s1922_s2 + $0x8] sm:$0xff] }
   0x5   :  { %1520 = vmatprep.subr.bf16.mxu0 %v1643_v0  ;;  %v31_v17 = vld [vmem:[%s1922_s2] sm:$0xff]  ;;  %v33_v19 = vld [vmem:[%s1922_s2 + $0x10] sm:$0xff]  ;;  %v34_v20 = vld [vmem:[%s1922_s2 + $0x18] sm:$0xff] }
   0x6   :  { %v35_v21 = vld [vmem:[%s1922_s2 + $0x20] sm:$0xff]  ;;  %v213_v23 = vld [vmem:[%s1923_s4 + $0x8] sm:$0xff]  ;;  %v214_v25 = vld [vmem:[%s1923_s4 + $0x10] sm:$0xff] }
   0x7   :  { %54 = vperm.xlu0 %1588, %v43_v13   ;;  %v212_v22 = vld [vmem:[%s1923_s4] sm:$0xff]  ;;  %v215_v26 = vld [vmem:[%s1923_s4 + $0x18] sm:$0xff]  ;;  %v211_v30 = vld [vmem:[%s1924_s1 + $0x8] sm:$0xf] }
   0x8   :  { %1522 = vmatpush3.bf16.msra.mxu0 %v1521_v8  ;;  %64 = vperm.xlu1 %1589, %v45_v14   ;;  %v1526_v24 = vpack.c.bf16 %v213_v23, %v212_v22  ;;  %v1530_v27 = vpack.c.bf16 %v215_v26, %v214_v25  ;;  %v216_v28 = vld [vmem:[%s1923_s4 + $0x20] sm:$0xff]  ;;  %v1634_v3 = vld [vmem:[%s1925_s6 + $0x8] sm:$0xff]   ;;  %v1635_v5 = vld [vmem:[%s1925_s6 + $0x10] sm:$0xff]  }
   0x9   :  { %1523 = vmatprep.subr.bf16.mxu0 %v1643_v0  ;;  %v210_v29 = vld [vmem:[%s1924_s1] sm:$0xff]  ;;  %v1636_v6 = vld [vmem:[%s1925_s6 + $0x18] sm:$0xff]   ;;  %v1638_v8 = vld [vmem:[%s1925_s6 + $0x28] sm:$0xff]  }
   0xa   :  { %1527 = vmatprep.subr.bf16.mxu1 %v1526_v24  ;;  %1384 = vmatprep.mubr.msk.f32.mxu1 %vm224_vm2, %v210_v29  ;;  %v1633_v31 = vld [vmem:[%s1925_s6] sm:$0xff]   ;;  %v1639_v9 = vld [vmem:[%s1925_s6 + $0x30] sm:$0xff]   ;;  %v1640_v10 = vld [vmem:[%s1925_s6 + $0x38] sm:$0xff]  }
   0xb   :  { %69 = vperm.xlu0 %1588, %v46_v16   ;;  %1529 = vmatpush3.bf16.msra.mxu1 %v1526_v24  ;;  %v1637_v7 = vld [vmem:[%s1925_s6 + $0x20] sm:$0xff]   ;;  %v1642_v12 = vld [vmem:[%s1925_s6 + $0x48] sm:$0xff]  }
   0xc   :  { %1525 = vmatpush3.bf16.msra.mxu0 %v1524_v15  ;;  %1531 = vmatprep.subr.bf16.mxu1 %v1530_v27  ;;  %v1641_v11 = vld [vmem:[%s1925_s6 + $0x40] sm:$0xff]   ;;  %s1647_s6 = smov 120  }
   0xd   :  { %1534 = vmatprep.subr.bf16.mxu0 %v1643_v0  ;;  %v1225_v13 = vld [vmem:[%s1926_s5] ss:$0 sm:$0xff] }
   0xf   :  { %1360 = vmatmul.mubr.msk.f32.vlgmr.msra.gmra.mrb[0].mxu0 %vm72_vm1, %v31_v17  ;;  %1533 = vmatpush3.bf16.msra.mxu1 %v1530_v27 }
  0x10   :  { %1362 = vmatprep.mubr.msk.f32.mxu0 %vm1644_vm0, %v1645_v4  ;;  %1382 = vmatprep.subr.mxu1 %v216_v28 }
  0x13   :  { %1363 = vmatmul.mubr.msk.f32.gmra.mrb[2].mxu0 %vm72_vm1, %v32_v18  ;;  %1383 = vmatpush3.msra.mxu1 %v216_v28 }
  0x14   :  { %1365 = vmatprep.mubr.msk.f32.mxu0 %vm1644_vm0, %v1645_v4  ;;  %1385 = vmatmul.mubr.msk.f32.vlgmr.msra.gmra.mrb[0].mxu1 %vm224_vm2, %v211_v30 }
  0x15   :  { %1393 = vmatprep.mubr.msk.bf16.mxu1 %vm224_vm2, %v1633_v31 }
  0x17   :  { %1366 = vmatmul.mubr.msk.f32.gmra.mrb[4].mxu0 %vm72_vm1, %v33_v19 }
  0x18   :  { %1368 = vmatprep.mubr.msk.f32.mxu0 %vm1644_vm0, %v1645_v4 }
  0x1b   :  { %1369 = vmatmul.mubr.msk.f32.gmra.mrb[6].mxu0 %vm72_vm1, %v34_v20 }
  0x1c   :  { %1371 = vmatprep.mubr.msk.f32.mxu0 %vm1644_vm0, %v1645_v4 }
  0x1f   :  { %1372 = vmatmul.mubr.msk.f32.gmra.mrb[8].mxu0 %vm72_vm1, %v35_v21 }
  0x20   :  { %1423 = vmatprep.mubr.msk.f32.mxu0 %vm1644_vm0, %v1645_v4 }
  0x82   :  { %v50_v32 = vpop.permute.xlu0 %49 }
  0x83   :  { %v60_v42 = vpop.permute.xlu1 %59 }
  0x86   :  { %v55_v37 = vpop.permute.xlu0 %54 }
  0x87   :  { %v65_v49 = vpop.permute.xlu1 %64 }
  0x8a   :  { %v70_v55 = vpop.permute.xlu0 %69 }
  0xe2   :  { %v154_v33 = vpop.f32.mrb[0].mxu0 }
  0xe3   :  { %v155_v34 = vadd.f32 %v154_v33, %v50_v32  ;;  %v1361_v35 = vpop.f32.mrb[1].mxu0 }
  0xe5   :  { %v178_v36 = vmax.f32 %v155_v34, 0.0 }
  0xe6   :  { %v159_v38 = vpop.f32.mrb[2].mxu0 }
  0xe7   :  { %v1263_v39 = vpack.c.bf16 %v178_v36, %v178_v36  ;;  %v160_v40 = vadd.f32 %v159_v38, %v55_v37  ;;  %v1364_v41 = vpop.f32.mrb[3].mxu0  ;;  %v1386_v14 = vpop.f32.mrb[0].mxu1 }
  0xe8   :  { %v303_v15 = vadd.f32 %v1386_v14, %v1225_v13  ;;  %v297_v16 = vpop.f32.mrb[1].mxu1 }
  0xe9   :  { %205 = vst.msk [vmem:[#allocation2] sm:$0xf] %vm204_vm3, %v1263_v39  ;;  %v179_v43 = vmax.f32 %v160_v40, 0.0  ;;  %v298_v17 = vadd.f32 %v1225_v13, %v297_v16 }
  0xea   :  { %v164_v44 = vpop.f32.mrb[4].mxu0  ;;  %v307_v18 = vmax.f32 %v303_v15, 0.0 }
  0xeb   :  { %v1264_v45 = vpack.c.bf16 %v179_v43, %v179_v43  ;;  %v165_v46 = vadd.f32 %v164_v44, %v60_v42  ;;  %v1367_v47 = vpop.f32.mrb[5].mxu0  ;;  %v306_v19 = vmax.f32 %v298_v17, 0.0 }
  0xec   :  { %310 = vst.msk [vmem:[#allocation3 + $0x8] sm:$0xf] %vm309_vm5, %v307_v18 }
  0xed   :  { %206 = vst.msk [vmem:[#allocation2 + $0x4] sm:$0xf] %vm204_vm3, %v1264_v45  ;;  %v180_v48 = vmax.f32 %v165_v46, 0.0 }
  0xee   :  { %v169_v50 = vpop.f32.mrb[6].mxu0  ;;  %308 = vst.msk [vmem:[#allocation3] sm:$0xff] %vm224_vm2, %v306_v19 }
  0xef   :  { %v1265_v51 = vpack.c.bf16 %v180_v48, %v180_v48  ;;  %v170_v52 = vadd.f32 %v169_v50, %v65_v49  ;;  %v1370_v53 = vpop.f32.mrb[7].mxu0 }
  0xf1   :  { %207 = vst.msk [vmem:[#allocation2 + $0x8] sm:$0xf] %vm204_vm3, %v1265_v51  ;;  %v181_v54 = vmax.f32 %v170_v52, 0.0 }
  0xf2   :  { %v174_v56 = vpop.f32.mrb[8].mxu0 }
  0xf3   :  { %v1266_v57 = vpack.c.bf16 %v181_v54, %v181_v54  ;;  %v175_v58 = vadd.f32 %v174_v56, %v70_v55  ;;  %v1373_v59 = vpop.f32.mrb[9].mxu0 }
  0xf4   :  { %v1630_v60 = vld [vmem:[#allocation2] sm:$0xff]  }
  0xf5   :  { %208 = vst.msk [vmem:[#allocation2 + $0xc] sm:$0xf] %vm204_vm3, %v1266_v57  ;;  %v182_v61 = vmax.f32 %v175_v58, 0.0  ;;  %1387 = vmatprep.subr.bf16.mxu1 %v1630_v60  ;;  %v1831_v34 = vld [vmem:[#allocation3] sm:$0xff] }
  0xf6   :  { %1388 = vmatpush3.bf16.msra.mxu1 %v1630_v60 }
  0xf7   :  { %v1267_v62 = vpack.c.bf16 %v182_v61, %v182_v61 }
  0xf9   :  { %209 = vst.msk [vmem:[#allocation2 + $0x10] sm:$0xf] %vm204_vm3, %v1267_v62 }
  0xfc   :  { %v1631_v63 = vld [vmem:[#allocation2 + $0x8] sm:$0xff]  }
  0xfd   :  { %1389 = vmatprep.subr.bf16.mxu1 %v1631_v63 }
  0xfe   :  { %1390 = vmatpush3.bf16.msra.mxu1 %v1631_v63 }
 0x100   :  { %v1632_v1 = vld [vmem:[#allocation2 + $0x10] ss:$0 sps:$4 sm:$0xff]  }
 0x101   :  { %1582 = vmatprep.subr.msk.bf16.mxu1 %vm432_vm4, %v1632_v1  ;;  %v434_v2 = vsel %vm432_vm4, %v1632_v1, 0  ;;  %v550_v1 = vld [vmem:[#allocation3 + $0x8] sm:$0xf] }
 0x102   :  { %1392 = vmatpush3.bf16.msra.mxu1 %v434_v2 }
 0x103   :  { %1558 = vmatprep.subr.bf16.mxu1 %v1643_v0 }
 0x105   :  { %1394 = vmatmul.mubr.msk.bf16.vlgmr.msra.gmra.mrb[4].mxu1 %vm224_vm2, %v1634_v3 }
 0x106   :  { %1397 = vmatprep.mubr.msk.bf16.mxu1 %vm224_vm2, %v1635_v5 }
 0x10d   :  { %1398 = vmatmul.mubr.msk.bf16.gmra.mrb[8].mxu1 %vm224_vm2, %v1636_v6 }
 0x10e   :  { %1401 = vmatprep.mubr.msk.bf16.mxu1 %vm224_vm2, %v1637_v7  ;;  %v841_v7 = vrot.slane %v1831_v34, 6 }
 0x115   :  { %1402 = vmatmul.mubr.msk.bf16.gmra.mrb[12].mxu1 %vm224_vm2, %v1638_v8  ;;  %v842_v8 = vrot.slane %v550_v1, 6 }
 0x116   :  { %1405 = vmatprep.mubr.msk.bf16.mxu1 %vm224_vm2, %v1639_v9 }
 0x11d   :  { %1406 = vmatmul.mubr.msk.bf16.gmra.mrb[16].mxu1 %vm224_vm2, %v1640_v10 }
 0x11e   :  { %1409 = vmatprep.mubr.msk.bf16.mxu1 %vm224_vm2, %v1641_v11  ;;  %v843_v11 = vsel %vm840_vm6, %v841_v7, %v842_v8 }
 0x125   :  { %1410 = vmatmul.mubr.msk.bf16.gmra.mrb[20].mxu1 %vm224_vm2, %v1642_v12 }
 0x126   :  { %1475 = vmatprep.mubr.msk.f32.mxu1 %vm1644_vm0, %v1645_v4 }
 0x1d8   :  { %v1395_v20 = vpop.f32.mrb[4].mxu1 }
 0x1d9   :  { %v470_v21 = vpop.f32.mrb[5].mxu1 }
 0x1da   :  { %v1396_v22 = vpop.f32.mrb[6].mxu1 }
 0x1db   :  { %v1595_v23 = vpack.i.bf16 %v1396_v22, %v1395_v20  ;;  %v1538_v24 = vpack.c.bf16 %v1396_v22, %v1395_v20  ;;  %v473_v25 = vpop.f32.mrb[7].mxu1 }
 0x1dc   :  { %v1590_v26 = vpack.i.bf16 %v473_v25, %v470_v21  ;;  %v1535_v27 = vpack.c.bf16 %v473_v25, %v470_v21 }
 0x1de   :  { %1591 = vrot.lane.b32.xlu1 %v1590_v26, %s1647_s6  ;;  %1536 = vmatpush3.bf16.msra.mxu0 %v1535_v27 }
 0x1df   :  { %1537 = vmatprep.subr.bf16.mxu0 %v1643_v0 }
 0x1e0   :  { %v1399_v28 = vpop.f32.mrb[8].mxu1 }
 0x1e1   :  { %v486_v29 = vpop.f32.mrb[9].mxu1 }
 0x1e2   :  { %1596 = vrot.lane.b32.xlu1 %v1595_v23, %s1647_s6  ;;  %1539 = vmatpush3.bf16.msra.mxu0 %v1538_v24  ;;  %v1400_v30 = vpop.f32.mrb[10].mxu1 }
 0x1e3   :  { %v489_v31 = vpop.f32.mrb[11].mxu1  ;;  %1421 = vmatprep.subr.mxu0 %v1645_v4 }
 0x1e4   :  { %v1600_v32 = vpack.i.bf16 %v1399_v28, %v489_v31  ;;  %v1541_v33 = vpack.c.bf16 %v1399_v28, %v489_v31 }
 0x1e6   :  { %1422 = vmatpush3.msra.mxu0 %v486_v29  ;;  %1601 = vrot.lane.b32.xlu0 %v1600_v32, %s1647_s6 }
 0x1e7   :  { %1424 = vmatmul.mubr.msk.f32.vlgmr.msra.gmra.mrb[10].mxu0 %vm224_vm2, %v1831_v34  ;;  %1540 = vmatprep.subr.bf16.mxu0 %v1643_v0 }
 0x1e8   :  { %v1403_v35 = vpop.f32.mrb[12].mxu1  ;;  %1542 = vmatpush3.bf16.msra.mxu0 %v1541_v33  ;;  %857 = vrot.lane.b32.xlu1 %v486_v29, %s1647_s6 }
 0x1e9   :  { %v502_v36 = vpop.f32.mrb[13].mxu1  ;;  %1543 = vmatprep.subr.bf16.mxu0 %v1643_v0  ;;  %1436 = vmatprep.mubr.msk.f32.mxu0 %vm1644_vm0, %v1645_v4 }
 0x1ea   :  { %v1605_v37 = vpack.i.bf16 %v502_v36, %v1400_v30  ;;  %v1544_v38 = vpack.c.bf16 %v502_v36, %v1400_v30  ;;  %v1404_v39 = vpop.f32.mrb[14].mxu1 }
 0x1eb   :  { %v1610_v40 = vpack.i.bf16 %v1404_v39, %v1403_v35  ;;  %v1547_v41 = vpack.c.bf16 %v1404_v39, %v1403_v35  ;;  %v505_v42 = vpop.f32.mrb[15].mxu1 }
 0x1ec   :  { %1606 = vrot.lane.b32.xlu0 %v1605_v37, %s1647_s6  ;;  %1545 = vmatpush3.bf16.msra.mxu0 %v1544_v38 }
 0x1ed   :  { %1434 = vmatprep.subr.mxu0 %v1645_v4  ;;  %1611 = vrot.lane.b32.xlu1 %v1610_v40, %s1647_s6 }
 0x1f0   :  { %v1407_v43 = vpop.f32.mrb[16].mxu1  ;;  %1435 = vmatpush3.msra.mxu0 %v505_v42  ;;  %949 = vrot.lane.b32.xlu0 %v505_v42, %s1647_s6 }
 0x1f1   :  { %v518_v44 = vpop.f32.mrb[17].mxu1  ;;  %1437 = vmatmul.mubr.msk.f32.vlgmr.msra.gmra.mrb[12].mxu0 %vm224_vm2, %v1831_v34  ;;  %1546 = vmatprep.subr.bf16.mxu0 %v1643_v0 }
 0x1f2   :  { %v1408_v45 = vpop.f32.mrb[18].mxu1  ;;  %1548 = vmatpush3.bf16.msra.mxu0 %v1547_v41  ;;  %1449 = vmatprep.mubr.msk.f32.mxu0 %vm1644_vm0, %v1645_v4 }
 0x1f3   :  { %v521_v46 = vpop.f32.mrb[19].mxu1  ;;  %1549 = vmatprep.subr.bf16.mxu0 %v1643_v0 }
 0x1f4   :  { %v1615_v47 = vpack.i.bf16 %v521_v46, %v518_v44  ;;  %v1550_v48 = vpack.c.bf16 %v521_v46, %v518_v44 }
 0x1f6   :  { %1616 = vrot.lane.b32.xlu1 %v1615_v47, %s1647_s6  ;;  %1551 = vmatpush3.bf16.msra.mxu0 %v1550_v48 }
 0x1f7   :  { %1447 = vmatprep.subr.mxu0 %v1645_v4 }
 0x1f8   :  { %v1411_v49 = vpop.f32.mrb[20].mxu1 }
 0x1f9   :  { %v534_v50 = vpop.f32.mrb[21].mxu1 }
 0x1fa   :  { %v1620_v51 = vpack.i.bf16 %v534_v50, %v1408_v45  ;;  %v1553_v52 = vpack.c.bf16 %v534_v50, %v1408_v45  ;;  %1448 = vmatpush3.msra.mxu0 %v1407_v43  ;;  %1039 = vrot.lane.b32.xlu1 %v1407_v43, %s1647_s6  ;;  %v1412_v53 = vpop.f32.mrb[22].mxu1 }
 0x1fb   :  { %1450 = vmatmul.mubr.msk.f32.vlgmr.msra.gmra.mrb[14].mxu0 %vm224_vm2, %v1831_v34  ;;  %1552 = vmatprep.subr.bf16.mxu0 %v1643_v0  ;;  %v537_v54 = vpop.f32.mrb[23].mxu1 }
 0x1fc   :  { %1621 = vrot.lane.b32.xlu0 %v1620_v51, %s1647_s6  ;;  %1554 = vmatpush3.bf16.msra.mxu0 %v1553_v52  ;;  %v1625_v55 = vpack.i.bf16 %v1411_v49, %v537_v54  ;;  %v1556_v56 = vpack.c.bf16 %v1411_v49, %v537_v54 }
 0x1fd   :  { %1555 = vmatprep.subr.bf16.mxu0 %v1643_v0  ;;  %1462 = vmatprep.mubr.msk.f32.mxu0 %vm1644_vm0, %v1645_v4 }
 0x200   :  { %1626 = vrot.lane.b32.xlu0 %v1625_v55, %s1647_s6  ;;  %1557 = vmatpush3.bf16.msra.mxu0 %v1556_v56 }
 0x201   :  { %1460 = vmatprep.subr.mxu0 %v1645_v4 }
 0x204   :  { %1129 = vrot.lane.b32.xlu0 %v1412_v53, %s1647_s6  ;;  %1461 = vmatpush3.msra.mxu0 %v1412_v53 }
 0x205   :  { %1463 = vmatmul.mubr.msk.f32.vlgmr.msra.gmra.mrb[16].mxu0 %vm224_vm2, %v1831_v34  ;;  %1564 = vmatprep.subr.bf16.mxu0 %v1643_v0 }
 0x206   :  { %1488 = vmatprep.mubr.msk.f32.mxu0 %vm1644_vm0, %v1645_v4 }
 0x250   :  { %v1592_v57 = vpop.permute.xlu1 %1591 }
 0x251   :  { %v1594_v58 = vunpack.i.h.bf16 %v1592_v57  ;;  %v1593_v59 = vunpack.i.l.bf16 %v1592_v57 }
 0x253   :  { %v1559_v60 = vpack.c.bf16 %v1594_v58, %v1593_v59 }
 0x254   :  { %v1597_v61 = vpop.permute.xlu1 %1596 }
 0x255   :  { %v1599_v62 = vunpack.i.h.bf16 %v1597_v61  ;;  %v1598_v63 = vunpack.i.l.bf16 %v1597_v61  ;;  %1560 = vmatpush3.bf16.msra.mxu1 %v1559_v60 }
 0x256   :  { %1561 = vmatprep.subr.bf16.mxu1 %v1643_v0 }
 0x257   :  { %v1562_v2 = vpack.c.bf16 %v1599_v62, %v1598_v63 }
 0x258   :  { %v1602_v3 = vpop.permute.xlu0 %1601 }
 0x259   :  { %1563 = vmatpush3.bf16.msra.mxu1 %v1562_v2  ;;  %v1604_v5 = vunpack.i.h.bf16 %v1602_v3  ;;  %v1603_v6 = vunpack.i.l.bf16 %v1602_v3 }
 0x25a   :  { %1473 = vmatprep.subr.mxu1 %v1645_v4  ;;  %v858_v10 = vpop.permute.xlu1 %857 }
 0x25b   :  { %v1565_v9 = vpack.c.bf16 %v1604_v5, %v1603_v6 }
 0x25d   :  { %1474 = vmatpush3.msra.mxu1 %v858_v10  ;;  %1566 = vmatpush3.bf16.msra.mxu0 %v1565_v9 }
 0x25e   :  { %1476 = vmatmul.mubr.msk.f32.vlgmr.msra.gmra.mrb[2].mxu1 %vm224_vm2, %v843_v11  ;;  %v1607_v12 = vpop.permute.xlu0 %1606  ;;  %1567 = vmatprep.subr.bf16.mxu0 %v1643_v0 }
 0x25f   :  { %v1609_v13 = vunpack.i.h.bf16 %v1607_v12  ;;  %v1608_v14 = vunpack.i.l.bf16 %v1607_v12  ;;  %v1612_v15 = vpop.permute.xlu1 %1611  ;;  %1570 = vmatprep.subr.bf16.mxu1 %v1643_v0  ;;  %1501 = vmatprep.mubr.msk.f32.mxu1 %vm1644_vm0, %v1645_v4 }
 0x260   :  { %v1614_v16 = vunpack.i.h.bf16 %v1612_v15  ;;  %v1613_v17 = vunpack.i.l.bf16 %v1612_v15 }
 0x261   :  { %v1568_v18 = vpack.c.bf16 %v1609_v13, %v1608_v14 }
 0x262   :  { %v1571_v19 = vpack.c.bf16 %v1614_v16, %v1613_v17  ;;  %v950_v20 = vpop.permute.xlu0 %949 }
 0x263   :  { %1569 = vmatpush3.bf16.msra.mxu0 %v1568_v18 }
 0x264   :  { %1486 = vmatprep.subr.mxu0 %v1645_v4  ;;  %1572 = vmatpush3.bf16.msra.mxu1 %v1571_v19 }
 0x265   :  { %1573 = vmatprep.subr.bf16.mxu1 %v1643_v0 }
 0x267   :  { %1487 = vmatpush3.msra.mxu0 %v950_v20 }
 0x268   :  { %v1617_v21 = vpop.permute.xlu1 %1616  ;;  %1489 = vmatmul.mubr.msk.f32.vlgmr.msra.gmra.mrb[18].mxu0 %vm224_vm2, %v843_v11  ;;  %1576 = vmatprep.subr.bf16.mxu0 %v1643_v0 }
 0x269   :  { %v1619_v22 = vunpack.i.h.bf16 %v1617_v21  ;;  %v1618_v23 = vunpack.i.l.bf16 %v1617_v21  ;;  %1514 = vmatprep.mubr.msk.f32.mxu0 %vm1644_vm0, %v1645_v4 }
 0x26b   :  { %v1574_v24 = vpack.c.bf16 %v1619_v22, %v1618_v23 }
 0x26c   :  { %v1040_v28 = vpop.permute.xlu1 %1039 }
 0x26d   :  { %1575 = vmatpush3.bf16.msra.mxu1 %v1574_v24 }
 0x26e   :  { %v1622_v25 = vpop.permute.xlu0 %1621  ;;  %1499 = vmatprep.subr.mxu1 %v1645_v4 }
 0x26f   :  { %v1624_v26 = vunpack.i.h.bf16 %v1622_v25  ;;  %v1623_v27 = vunpack.i.l.bf16 %v1622_v25 }
 0x271   :  { %v1577_v29 = vpack.c.bf16 %v1624_v26, %v1623_v27  ;;  %1500 = vmatpush3.msra.mxu1 %v1040_v28 }
 0x272   :  { %1502 = vmatmul.mubr.msk.f32.vlgmr.msra.gmra.mrb[24].mxu1 %vm224_vm2, %v843_v11  ;;  %v1627_v30 = vpop.permute.xlu0 %1626 }
 0x273   :  { %v1629_v31 = vunpack.i.h.bf16 %v1627_v30  ;;  %v1628_v32 = vunpack.i.l.bf16 %v1627_v30  ;;  %1578 = vmatpush3.bf16.msra.mxu0 %v1577_v29 }
 0x274   :  { %1579 = vmatprep.subr.bf16.mxu0 %v1643_v0 }
 0x275   :  { %v1580_v33 = vpack.c.bf16 %v1629_v31, %v1628_v32 }
 0x276   :  { %v1130_v34 = vpop.permute.xlu0 %1129 }
 0x277   :  { %1581 = vmatpush3.bf16.msra.mxu0 %v1580_v33 }
 0x278   :  { %1512 = vmatprep.subr.mxu0 %v1645_v4 }
 0x27b   :  { %1513 = vmatpush3.msra.mxu0 %v1130_v34 }
 0x27c   :  { %1515 = vmatmul.mubr.msk.f32.vlgmr.msra.gmra.mrb[20].mxu0 %vm224_vm2, %v843_v11 }
 0x2ba   :  { %v620_v35 = vpop.f32.mrb[10].mxu0 }
 0x2bb   :  { %835 = vst.msk [vmem:[%s1927_s7] sm:$0x3f] %vm834_vm7, %v620_v35  ;;  %v1425_v36 = vpop.f32.mrb[11].mxu0 }
 0x2c4   :  { %v690_v37 = vpop.f32.mrb[12].mxu0 }
 0x2c5   :  { %836 = vst.msk [vmem:[%s1927_s7 + $0x8] sm:$0x3f] %vm834_vm7, %v690_v37  ;;  %v1438_v0 = vpop.f32.mrb[13].mxu0 }
 0x2ce   :  { %v760_v4 = vpop.f32.mrb[14].mxu0 }
 0x2cf   :  { %837 = vst.msk [vmem:[%s1927_s7 + $0x10] sm:$0x3f] %vm834_vm7, %v760_v4  ;;  %v1451_v38 = vpop.f32.mrb[15].mxu0 }
 0x2d8   :  { %v830_v39 = vpop.f32.mrb[16].mxu0 }
 0x2d9   :  { %838 = vst.msk [vmem:[%s1927_s7 + $0x18] sm:$0x3f] %vm834_vm7, %v830_v39  ;;  %v1464_v40 = vpop.f32.mrb[17].mxu0 }
 0x331   :  { %v932_v41 = vpop.f32.mrb[2].mxu1 }
 0x332   :  { %1259 = vst.msk [vmem:[%s1927_s7 + $0x20] sm:$0x3f] %vm834_vm7, %v932_v41  ;;  %v1477_v42 = vpop.f32.mrb[3].mxu1 }
 0x33b   :  { %v1022_v43 = vpop.f32.mrb[18].mxu0 }
 0x33c   :  { %1260 = vst.msk [vmem:[%s1927_s7 + $0x28] sm:$0x3f] %vm834_vm7, %v1022_v43  ;;  %v1490_v44 = vpop.f32.mrb[19].mxu0 }
 0x345   :  { %v1112_v45 = vpop.f32.mrb[24].mxu1 }
 0x346   :  { %1261 = vst.msk [vmem:[%s1927_s7 + $0x30] sm:$0x3f] %vm834_vm7, %v1112_v45  ;;  %v1503_v46 = vpop.f32.mrb[25].mxu1 }
 0x34f   :  { %v1202_v47 = vpop.f32.mrb[20].mxu0 }
 0x350   :  { %1262 = vst.msk [vmem:[%s1927_s7 + $0x38] sm:$0x3f] %vm834_vm7, %v1202_v47  ;;  %v1516_v48 = vpop.f32.mrb[21].mxu0 }

</bundles_post_ra>
